<compile_context>
chip_gen: v7x
topology: tpu7x:2x2x1
jax: 0.10.0
libtpu: 0.0.40
codegen_flags: <defaults>
</compile_context>

<pallas_src>
import jax
import jax.numpy as jnp
from jax.experimental import pallas as pl
from jax.experimental.pallas import tpu as pltpu

# ---------------- model hyper-parameters (small, synthetic) ----------------
B = 2          # batch
S = 8          # sequence length
H = 32         # hidden size
NH = 2         # attention heads
DH = H // NH   # head dim
F = 64         # FFN intermediate size
VOCAB = 100
VOCAB_PAD = 128            # one-hot contraction width (>= VOCAB, lane-aligned)
MAX_POS = 64
NLAYERS = 2
EPS = 1e-12    # BERT LayerNorm eps

BS = B * S

# packed per-layer weight layout, every segment 128-lane aligned
OFF_QKV = 0      # [Wq*scale | Wk | Wv]  -> 3H = 96 cols
OFF_WO = 128     # Wo                    -> H  = 32 cols
OFF_W1 = 256     # W1                    -> F  = 64 cols
OFF_W2T = 384    # W2^T                  -> F  = 64 cols
W_PAD = 512


# ---------------- in-kernel helpers ----------------
def _layernorm(x, g, b):
    mu = jnp.mean(x, axis=-1, keepdims=True)
    var = jnp.mean(jnp.square(x - mu), axis=-1, keepdims=True)
    return (x - mu) * jax.lax.rsqrt(var + EPS) * g + b


def _gelu(x):
    # TODO(synk): HF BERT defaults to exact erf GELU; tanh approximation used here.
    return jax.nn.gelu(x, approximate=True)


# ---------------- fused Pallas kernel (single invocation, no grid) ----------------
def fused_encoder_kernel(ids_ref, mask_ref, wemb_ref, pt_ref, embln_ref,
                         w_ref, vec_ref, o_ref, x_scr):
    # ---- embeddings: one-hot gather on the MXU + pos/type add + LayerNorm ----
    ids = ids_ref[...]                                                  # (BS, 1) int32
    onehot = (jax.lax.broadcasted_iota(jnp.int32, (BS, VOCAB_PAD), 1)
              == ids).astype(jnp.float32)                               # (BS, 128)
    word = jnp.dot(onehot, wemb_ref[...],
                   preferred_element_type=jnp.float32)                  # exact gather
    x = _layernorm(word + pt_ref[...],
                   embln_ref[0:1, :], embln_ref[1:2, :])                # (BS, H) f32

    # ---- additive attention bias, computed once and hoisted out of the layer loop ----
    bias = (1.0 - mask_ref[...].astype(jnp.float32)) * -1e9             # (B, 1, S)
    bias3 = jnp.concatenate([bias] * NH, axis=0)                        # (NH*B, 1, S)

    for l in range(NLAYERS):        # static unroll: NLAYERS=2, nothing to pipeline
        w_l = w_ref[l]              # (H, W_PAD) bf16, 128-lane-aligned segments
        vec = vec_ref[l]            # (8, 128)   f32

        bqkv = vec[0:1, 0:3 * H]
        bo = vec[1:2, 0:H]
        b1 = vec[2:3, 0:F]
        b2 = vec[3:4, 0:H]
        ln1g, ln1b = vec[4:5, 0:H], vec[5:6, 0:H]
        ln2g, ln2b = vec[6:7, 0:H], vec[7:8, 0:H]

        xb = x.astype(jnp.bfloat16)

        # --- attention: one packed QKV matmul, heads folded into the batch dim ---
        # (scale 1/sqrt(DH) is already folded into the Wq columns / bq at packing time)
        qkv = (jnp.dot(xb, w_l[:, OFF_QKV:OFF_QKV + 3 * H],
                       preferred_element_type=jnp.float32)
               + bqkv).astype(jnp.bfloat16)                             # cast once
        q = jnp.concatenate(
            [qkv[:, h * DH:(h + 1) * DH].reshape(B, S, DH) for h in range(NH)], axis=0)
        k = jnp.concatenate(
            [qkv[:, H + h * DH:H + (h + 1) * DH].reshape(B, S, DH) for h in range(NH)],
            axis=0)
        v = jnp.concatenate(
            [qkv[:, 2 * H + h * DH:2 * H + (h + 1) * DH].reshape(B, S, DH)
             for h in range(NH)], axis=0)                               # (NH*B, S, DH)

        s = jnp.einsum('bqd,bkd->bqk', q, k,
                       preferred_element_type=jnp.float32) + bias3      # (NH*B, S, S)
        m = jnp.max(s, axis=-1, keepdims=True)
        p = jnp.exp(s - m)
        p = p * pl.reciprocal(jnp.sum(p, axis=-1, keepdims=True), approx=True)

        ctx = jnp.einsum('bqk,bkd->bqd', p.astype(jnp.bfloat16), v,
                         preferred_element_type=jnp.float32)             # (NH*B, S, DH)
        ctx = jnp.concatenate(
            [ctx[h * B:(h + 1) * B].reshape(BS, DH) for h in range(NH)],
            axis=1).astype(jnp.bfloat16)                                 # (BS, H)

        attn = jnp.dot(ctx, w_l[:, OFF_WO:OFF_WO + H],
                       preferred_element_type=jnp.float32) + bo          # single Wo push

        h1 = _layernorm(x + attn, ln1g, ln1b)

        # --- FFN ---
        ff = _gelu(jnp.dot(h1.astype(jnp.bfloat16), w_l[:, OFF_W1:OFF_W1 + F],
                           preferred_element_type=jnp.float32) + b1)
        ff2 = jax.lax.dot_general(ff.astype(jnp.bfloat16),
                                  w_l[:, OFF_W2T:OFF_W2T + F],
                                  (((1,), (1,)), ((), ())),
                                  preferred_element_type=jnp.float32) + b2
        x = _layernorm(h1 + ff2, ln2g, ln2b)

    # --- only the CLS rows leave the kernel: strided sublane read, no reshape/gather ---
    x_scr[...] = x
    o_ref[...] = x_scr[pl.ds(0, B, stride=S), :]


def fused_encoder(ids2d, mask3d, word_emb, pos_type, emb_ln, w_all, vec_all):
    vmem = pl.BlockSpec(memory_space=pltpu.MemorySpace.VMEM)
    return pl.pallas_call(
        fused_encoder_kernel,
        out_shape=jax.ShapeDtypeStruct((B, H), jnp.float32),
        in_specs=[vmem] * 7,
        out_specs=vmem,
        scratch_shapes=[pltpu.VMEM((BS, H), jnp.float32)],
        # TODO(synk): at real sizes add a "parallel" batch-block grid axis (v7x 2nd TC)
        # and set pltpu.CompilerParams(vmem_limit_bytes=...) against v7x's 64 MiB VMEM.
    )(ids2d, mask3d, word_emb, pos_type, emb_ln, w_all, vec_all)


# ---------------- parameter init (deterministic, synthetic) ----------------
def init_params(key):
    def nrm(k, shape, scale=0.02):
        return (scale * jax.random.normal(k, shape)).astype(jnp.float32)

    def row128(vv):
        vv = vv.reshape(1, -1)
        return jnp.pad(vv, ((0, 0), (0, 128 - vv.shape[1])))

    keys = jax.random.split(key, 4 + NLAYERS)
    word_emb = nrm(keys[0], (VOCAB, H))
    pos_emb = nrm(keys[1], (MAX_POS, H))
    type_emb = nrm(keys[2], (2, H))

    params = {
        # padded to the 128-row one-hot contraction (pad rows are never selected)
        "word_emb": jnp.pad(word_emb, ((0, VOCAB_PAD - VOCAB), (0, 0))),
        # position + token-type-0 embeddings, pre-tiled to the (BS, H) activation slab
        "pos_type": jnp.tile(pos_emb[:S] + type_emb[0][None, :], (B, 1)),
        "emb_ln": jnp.concatenate([jnp.ones((1, H), jnp.float32),
                                   jnp.zeros((1, H), jnp.float32)], axis=0),
    }

    scale = 1.0 / (DH ** 0.5)
    w_layers, v_layers = [], []
    for l in range(NLAYERS):
        lk = jax.random.split(keys[4 + l], 8)
        wq, wk, wv, wo = (nrm(lk[0], (H, H)), nrm(lk[1], (H, H)),
                          nrm(lk[2], (H, H)), nrm(lk[3], (H, H)))
        w1, w2 = nrm(lk[4], (H, F)), nrm(lk[5], (F, H))
        bq = jnp.zeros((H,), jnp.float32)
        bk = jnp.zeros((H,), jnp.float32)
        bv = jnp.zeros((H,), jnp.float32)

        w = jnp.zeros((H, W_PAD), jnp.float32)
        w = w.at[:, OFF_QKV:OFF_QKV + H].set(wq * scale)   # 1/sqrt(DH) folded into Wq
        w = w.at[:, OFF_QKV + H:OFF_QKV + 2 * H].set(wk)
        w = w.at[:, OFF_QKV + 2 * H:OFF_QKV + 3 * H].set(wv)
        w = w.at[:, OFF_WO:OFF_WO + H].set(wo)             # 128-lane aligned segments
        w = w.at[:, OFF_W1:OFF_W1 + F].set(w1)
        w = w.at[:, OFF_W2T:OFF_W2T + F].set(w2.T)
        w_layers.append(w.astype(jnp.bfloat16))

        rows = [
            row128(jnp.concatenate([bq * scale, bk, bv])),  # bqkv (scale folded into bq)
            row128(jnp.zeros((H,), jnp.float32)),           # bo
            row128(jnp.zeros((F,), jnp.float32)),           # b1
            row128(jnp.zeros((H,), jnp.float32)),           # b2
            row128(jnp.ones((H,), jnp.float32)),            # ln1 gamma
            row128(jnp.zeros((H,), jnp.float32)),           # ln1 beta
            row128(jnp.ones((H,), jnp.float32)),            # ln2 gamma
            row128(jnp.zeros((H,), jnp.float32)),           # ln2 beta
        ]
        v_layers.append(jnp.concatenate(rows, axis=0))      # (8, 128)

    params["w_all"] = jnp.stack(w_layers, axis=0)           # (NLAYERS, H, W_PAD) bf16
    params["vec_all"] = jnp.stack(v_layers, axis=0)         # (NLAYERS, 8, 128)  f32
    return params


# ---------------- TextEncoder forward ----------------
def text_encoder_forward(params, input_ids, attention_mask):
    # Only trivial layout prep stays outside the kernel (fused away under jit);
    # the embedding gather, mask->bias and the whole encoder run inside one pallas_call.
    ids2d = input_ids.reshape(BS, 1).astype(jnp.int32)
    mask3d = attention_mask.reshape(B, 1, S).astype(jnp.int32)
    # outputs.last_hidden_state[:, 0, :]  ->  CLS-token hidden state
    return fused_encoder(ids2d, mask3d, params["word_emb"], params["pos_type"],
                         params["emb_ln"], params["w_all"], params["vec_all"])


if __name__ == "__main__":
    key = jax.random.PRNGKey(0)
    kp, kid = jax.random.split(key)
    params = init_params(kp)

    input_ids = jax.random.randint(kid, (B, S), 0, VOCAB, dtype=jnp.int32)
    attention_mask = jnp.ones((B, S), dtype=jnp.int32).at[1, 6:].set(0)

    out = jax.jit(text_encoder_forward)(params, input_ids, attention_mask)
    out = jax.block_until_ready(out)
    assert out.shape == (B, H) and out.dtype == jnp.float32
    assert bool(jnp.all(jnp.isfinite(out)))
    print("KERNEL_OK")
</pallas_src>

<mosaic_0001>
module attributes {stable_mosaic.version = 11 : i64} {
  func.func @fused_encoder_kernel(%arg0: memref<16x1xi32, #tpu.memory_space<vmem>>, %arg1: memref<2x1x8xi32, #tpu.memory_space<vmem>>, %arg2: memref<128x32xf32, #tpu.memory_space<vmem>>, %arg3: memref<16x32xf32, #tpu.memory_space<vmem>>, %arg4: memref<2x32xf32, #tpu.memory_space<vmem>>, %arg5: memref<2x32x512xbf16, #tpu.memory_space<vmem>>, %arg6: memref<2x8x128xf32, #tpu.memory_space<vmem>>, %arg7: memref<2x32xf32, #tpu.memory_space<vmem>>, %arg8: memref<16x32xf32, #tpu.memory_space<vmem>>) attributes {dimension_semantics = [], scalar_prefetch = 0 : i64, scratch_operands = 1 : i64, tpu.core_type = #tpu.core_type<tc>} {
    %c0 = arith.constant 0 : index
    %c0_0 = arith.constant 0 : index
    %0 = vector.load %arg0[%c0, %c0_0] : memref<16x1xi32, #tpu.memory_space<vmem>>, vector<16x1xi32>
    %1 = tpu.iota {dimensions = array<i32: 1>} : vector<16x128xi32>
    %2 = vector.broadcast %0 : vector<16x1xi32> to vector<16x128xi32>
    %3 = arith.cmpi eq, %1, %2 : vector<16x128xi32>
    %4 = arith.extui %3 : vector<16x128xi1> to vector<16x128xi32>
    %5 = arith.sitofp %4 : vector<16x128xi32> to vector<16x128xf32>
    %c0_1 = arith.constant 0 : index
    %c0_2 = arith.constant 0 : index
    %6 = vector.load %arg2[%c0_1, %c0_2] : memref<128x32xf32, #tpu.memory_space<vmem>>, vector<128x32xf32>
    %cst = arith.constant dense<0.000000e+00> : vector<16x32xf32>
    %7 = tpu.matmul %5, %6, %cst {dimension_numbers = #tpu.dot_dimension_numbers<[1], [0], [0], [1], [0, 0, 1, 1], [], []>} : vector<16x128xf32>, vector<128x32xf32>, vector<16x32xf32> -> vector<16x32xf32>
    %c0_3 = arith.constant 0 : index
    %c0_4 = arith.constant 0 : index
    %8 = vector.load %arg3[%c0_3, %c0_4] : memref<16x32xf32, #tpu.memory_space<vmem>>, vector<16x32xf32>
    %9 = arith.addf %7, %8 : vector<16x32xf32>
    %c0_5 = arith.constant 0 : index
    %c0_6 = arith.constant 0 : index
    %10 = vector.load %arg4[%c0_5, %c0_6] : memref<2x32xf32, #tpu.memory_space<vmem>>, vector<1x32xf32>
    %c1 = arith.constant 1 : index
    %c0_7 = arith.constant 0 : index
    %11 = vector.load %arg4[%c1, %c0_7] : memref<2x32xf32, #tpu.memory_space<vmem>>, vector<1x32xf32>
    %cst_8 = arith.constant dense<0.000000e+00> : vector<16xf32>
    %12 = vector.multi_reduction <add>, %9, %cst_8 [1] : vector<16x32xf32> to vector<16xf32>
    %13 = vector.shape_cast %12 : vector<16xf32> to vector<16x1xf32>
    %cst_9 = arith.constant 3.200000e+01 : f32
    %14 = vector.broadcast %cst_9 : f32 to vector<16x1xf32>
    %15 = arith.divf %13, %14 : vector<16x1xf32>
    %16 = vector.broadcast %15 : vector<16x1xf32> to vector<16x32xf32>
    %17 = arith.subf %9, %16 : vector<16x32xf32>
    %18 = arith.mulf %17, %17 : vector<16x32xf32>
    %cst_10 = arith.constant dense<0.000000e+00> : vector<16xf32>
    %19 = vector.multi_reduction <add>, %18, %cst_10 [1] : vector<16x32xf32> to vector<16xf32>
    %20 = vector.shape_cast %19 : vector<16xf32> to vector<16x1xf32>
    %cst_11 = arith.constant 3.200000e+01 : f32
    %21 = vector.broadcast %cst_11 : f32 to vector<16x1xf32>
    %22 = arith.divf %20, %21 : vector<16x1xf32>
    %23 = vector.broadcast %15 : vector<16x1xf32> to vector<16x32xf32>
    %24 = arith.subf %9, %23 : vector<16x32xf32>
    %cst_12 = arith.constant 9.99999996E-13 : f32
    %25 = vector.broadcast %cst_12 : f32 to vector<16x1xf32>
    %26 = arith.addf %22, %25 : vector<16x1xf32>
    %27 = math.rsqrt %26 : vector<16x1xf32>
    %28 = vector.broadcast %27 : vector<16x1xf32> to vector<16x32xf32>
    %29 = arith.mulf %24, %28 : vector<16x32xf32>
    %30 = vector.broadcast %10 : vector<1x32xf32> to vector<16x32xf32>
    %31 = arith.mulf %29, %30 : vector<16x32xf32>
    %32 = vector.broadcast %11 : vector<1x32xf32> to vector<16x32xf32>
    %33 = arith.addf %31, %32 : vector<16x32xf32>
    %c0_13 = arith.constant 0 : index
    %c0_14 = arith.constant 0 : index
    %c0_15 = arith.constant 0 : index
    %34 = vector.load %arg1[%c0_13, %c0_14, %c0_15] : memref<2x1x8xi32, #tpu.memory_space<vmem>>, vector<2x1x8xi32>
    %35 = arith.sitofp %34 : vector<2x1x8xi32> to vector<2x1x8xf32>
    %cst_16 = arith.constant 1.000000e+00 : f32
    %36 = vector.broadcast %cst_16 : f32 to vector<2x1x8xf32>
    %37 = arith.subf %36, %35 : vector<2x1x8xf32>
    %cst_17 = arith.constant -1.000000e+09 : f32
    %38 = vector.broadcast %cst_17 : f32 to vector<2x1x8xf32>
    %39 = arith.mulf %37, %38 : vector<2x1x8xf32>
    %40 = tpu.concatenate %39, %39 in 0 : vector<2x1x8xf32>, vector<2x1x8xf32> -> vector<4x1x8xf32>
    %c0_18 = arith.constant 0 : index
    %c0_19 = arith.constant 0 : index
    %c0_20 = arith.constant 0 : index
    %41 = vector.load %arg5[%c0_18, %c0_19, %c0_20] : memref<2x32x512xbf16, #tpu.memory_space<vmem>>, vector<1x32x512xbf16>
    %42 = vector.shape_cast %41 : vector<1x32x512xbf16> to vector<32x512xbf16>
    %c0_21 = arith.constant 0 : index
    %c0_22 = arith.constant 0 : index
    %c0_23 = arith.constant 0 : index
    %43 = vector.load %arg6[%c0_21, %c0_22, %c0_23] : memref<2x8x128xf32, #tpu.memory_space<vmem>>, vector<1x8x128xf32>
    %44 = vector.shape_cast %43 : vector<1x8x128xf32> to vector<8x128xf32>
    %45 = vector.extract_strided_slice %44 {offsets = [0, 0], sizes = [1, 96], strides = [1, 1]} : vector<8x128xf32> to vector<1x96xf32>
    %46 = vector.extract_strided_slice %44 {offsets = [1, 0], sizes = [1, 32], strides = [1, 1]} : vector<8x128xf32> to vector<1x32xf32>
    %47 = vector.extract_strided_slice %44 {offsets = [2, 0], sizes = [1, 64], strides = [1, 1]} : vector<8x128xf32> to vector<1x64xf32>
    %48 = vector.extract_strided_slice %44 {offsets = [3, 0], sizes = [1, 32], strides = [1, 1]} : vector<8x128xf32> to vector<1x32xf32>
    %49 = vector.extract_strided_slice %44 {offsets = [4, 0], sizes = [1, 32], strides = [1, 1]} : vector<8x128xf32> to vector<1x32xf32>
    %50 = vector.extract_strided_slice %44 {offsets = [5, 0], sizes = [1, 32], strides = [1, 1]} : vector<8x128xf32> to vector<1x32xf32>
    %51 = vector.extract_strided_slice %44 {offsets = [6, 0], sizes = [1, 32], strides = [1, 1]} : vector<8x128xf32> to vector<1x32xf32>
    %52 = vector.extract_strided_slice %44 {offsets = [7, 0], sizes = [1, 32], strides = [1, 1]} : vector<8x128xf32> to vector<1x32xf32>
    %53 = arith.truncf %33 : vector<16x32xf32> to vector<16x32xbf16>
    %54 = vector.extract_strided_slice %42 {offsets = [0, 0], sizes = [32, 96], strides = [1, 1]} : vector<32x512xbf16> to vector<32x96xbf16>
    %cst_24 = arith.constant dense<0.000000e+00> : vector<16x96xf32>
    %55 = tpu.matmul %53, %54, %cst_24 {dimension_numbers = #tpu.dot_dimension_numbers<[1], [0], [0], [1], [0, 0, 1, 1], [], []>} : vector<16x32xbf16>, vector<32x96xbf16>, vector<16x96xf32> -> vector<16x96xf32>
    %56 = vector.broadcast %45 : vector<1x96xf32> to vector<16x96xf32>
    %57 = arith.addf %55, %56 : vector<16x96xf32>
    %58 = arith.truncf %57 : vector<16x96xf32> to vector<16x96xbf16>
    %59 = vector.extract_strided_slice %58 {offsets = [0, 0], sizes = [16, 16], strides = [1, 1]} : vector<16x96xbf16> to vector<16x16xbf16>
    %60 = vector.shape_cast %59 : vector<16x16xbf16> to vector<2x8x16xbf16>
    %61 = vector.extract_strided_slice %58 {offsets = [0, 16], sizes = [16, 16], strides = [1, 1]} : vector<16x96xbf16> to vector<16x16xbf16>
    %62 = vector.shape_cast %61 : vector<16x16xbf16> to vector<2x8x16xbf16>
    %63 = tpu.concatenate %60, %62 in 0 : vector<2x8x16xbf16>, vector<2x8x16xbf16> -> vector<4x8x16xbf16>
    %64 = vector.extract_strided_slice %58 {offsets = [0, 32], sizes = [16, 16], strides = [1, 1]} : vector<16x96xbf16> to vector<16x16xbf16>
    %65 = vector.shape_cast %64 : vector<16x16xbf16> to vector<2x8x16xbf16>
    %66 = vector.extract_strided_slice %58 {offsets = [0, 48], sizes = [16, 16], strides = [1, 1]} : vector<16x96xbf16> to vector<16x16xbf16>
    %67 = vector.shape_cast %66 : vector<16x16xbf16> to vector<2x8x16xbf16>
    %68 = tpu.concatenate %65, %67 in 0 : vector<2x8x16xbf16>, vector<2x8x16xbf16> -> vector<4x8x16xbf16>
    %69 = vector.extract_strided_slice %58 {offsets = [0, 64], sizes = [16, 16], strides = [1, 1]} : vector<16x96xbf16> to vector<16x16xbf16>
    %70 = vector.shape_cast %69 : vector<16x16xbf16> to vector<2x8x16xbf16>
    %71 = vector.extract_strided_slice %58 {offsets = [0, 80], sizes = [16, 16], strides = [1, 1]} : vector<16x96xbf16> to vector<16x16xbf16>
    %72 = vector.shape_cast %71 : vector<16x16xbf16> to vector<2x8x16xbf16>
    %73 = tpu.concatenate %70, %72 in 0 : vector<2x8x16xbf16>, vector<2x8x16xbf16> -> vector<4x8x16xbf16>
    "tpu.trace_start"() <{level = 10 : i32, message = "bqd,bkd->bqk"}> : () -> ()
    %cst_25 = arith.constant dense<0.000000e+00> : vector<4x8x8xf32>
    %74 = tpu.matmul %63, %68, %cst_25 {dimension_numbers = #tpu.dot_dimension_numbers<[2], [2], [1], [1], [0, 0, 0, 1, 1, 1], [0], [0]>} : vector<4x8x16xbf16>, vector<4x8x16xbf16>, vector<4x8x8xf32> -> vector<4x8x8xf32>
    "tpu.trace_stop"() : () -> ()
    %75 = vector.broadcast %40 : vector<4x1x8xf32> to vector<4x8x8xf32>
    %76 = arith.addf %74, %75 : vector<4x8x8xf32>
    %cst_26 = arith.constant dense<0xFF800000> : vector<4x8xf32>
    %77 = vector.multi_reduction <maximumf>, %76, %cst_26 [2] : vector<4x8x8xf32> to vector<4x8xf32>
    %78 = vector.shape_cast %77 : vector<4x8xf32> to vector<4x8x1xf32>
    %79 = vector.broadcast %78 : vector<4x8x1xf32> to vector<4x8x8xf32>
    %80 = arith.subf %76, %79 : vector<4x8x8xf32>
    %81 = math.exp %80 : vector<4x8x8xf32>
    %cst_27 = arith.constant dense<0.000000e+00> : vector<4x8xf32>
    %82 = vector.multi_reduction <add>, %81, %cst_27 [2] : vector<4x8x8xf32> to vector<4x8xf32>
    %83 = vector.shape_cast %82 : vector<4x8xf32> to vector<4x8x1xf32>
    %84 = tpu.reciprocal %83 {approx = true} : vector<4x8x1xf32> -> vector<4x8x1xf32>
    %85 = vector.broadcast %84 : vector<4x8x1xf32> to vector<4x8x8xf32>
    %86 = arith.mulf %81, %85 : vector<4x8x8xf32>
    %87 = arith.truncf %86 : vector<4x8x8xf32> to vector<4x8x8xbf16>
    "tpu.trace_start"() <{level = 10 : i32, message = "bqk,bkd->bqd"}> : () -> ()
    %cst_28 = arith.constant dense<0.000000e+00> : vector<4x8x16xf32>
    %88 = tpu.matmul %87, %73, %cst_28 {dimension_numbers = #tpu.dot_dimension_numbers<[2], [1], [1], [2], [0, 0, 0, 1, 1, 2], [0], [0]>} : vector<4x8x8xbf16>, vector<4x8x16xbf16>, vector<4x8x16xf32> -> vector<4x8x16xf32>
    "tpu.trace_stop"() : () -> ()
    %89 = vector.extract_strided_slice %88 {offsets = [0, 0, 0], sizes = [2, 8, 16], strides = [1, 1, 1]} : vector<4x8x16xf32> to vector<2x8x16xf32>
    %90 = vector.shape_cast %89 : vector<2x8x16xf32> to vector<16x16xf32>
    %91 = vector.extract_strided_slice %88 {offsets = [2, 0, 0], sizes = [2, 8, 16], strides = [1, 1, 1]} : vector<4x8x16xf32> to vector<2x8x16xf32>
    %92 = vector.shape_cast %91 : vector<2x8x16xf32> to vector<16x16xf32>
    %93 = tpu.concatenate %90, %92 in 1 : vector<16x16xf32>, vector<16x16xf32> -> vector<16x32xf32>
    %94 = arith.truncf %93 : vector<16x32xf32> to vector<16x32xbf16>
    %95 = vector.extract_strided_slice %42 {offsets = [0, 128], sizes = [32, 32], strides = [1, 1]} : vector<32x512xbf16> to vector<32x32xbf16>
    %cst_29 = arith.constant dense<0.000000e+00> : vector<16x32xf32>
    %96 = tpu.matmul %94, %95, %cst_29 {dimension_numbers = #tpu.dot_dimension_numbers<[1], [0], [0], [1], [0, 0, 1, 1], [], []>} : vector<16x32xbf16>, vector<32x32xbf16>, vector<16x32xf32> -> vector<16x32xf32>
    %97 = vector.broadcast %46 : vector<1x32xf32> to vector<16x32xf32>
    %98 = arith.addf %96, %97 : vector<16x32xf32>
    %99 = arith.addf %33, %98 : vector<16x32xf32>
    %cst_30 = arith.constant dense<0.000000e+00> : vector<16xf32>
    %100 = vector.multi_reduction <add>, %99, %cst_30 [1] : vector<16x32xf32> to vector<16xf32>
    %101 = vector.shape_cast %100 : vector<16xf32> to vector<16x1xf32>
    %cst_31 = arith.constant 3.200000e+01 : f32
    %102 = vector.broadcast %cst_31 : f32 to vector<16x1xf32>
    %103 = arith.divf %101, %102 : vector<16x1xf32>
    %104 = vector.broadcast %103 : vector<16x1xf32> to vector<16x32xf32>
    %105 = arith.subf %99, %104 : vector<16x32xf32>
    %106 = arith.mulf %105, %105 : vector<16x32xf32>
    %cst_32 = arith.constant dense<0.000000e+00> : vector<16xf32>
    %107 = vector.multi_reduction <add>, %106, %cst_32 [1] : vector<16x32xf32> to vector<16xf32>
    %108 = vector.shape_cast %107 : vector<16xf32> to vector<16x1xf32>
    %cst_33 = arith.constant 3.200000e+01 : f32
    %109 = vector.broadcast %cst_33 : f32 to vector<16x1xf32>
    %110 = arith.divf %108, %109 : vector<16x1xf32>
    %111 = vector.broadcast %103 : vector<16x1xf32> to vector<16x32xf32>
    %112 = arith.subf %99, %111 : vector<16x32xf32>
    %cst_34 = arith.constant 9.99999996E-13 : f32
    %113 = vector.broadcast %cst_34 : f32 to vector<16x1xf32>
    %114 = arith.addf %110, %113 : vector<16x1xf32>
    %115 = math.rsqrt %114 : vector<16x1xf32>
    %116 = vector.broadcast %115 : vector<16x1xf32> to vector<16x32xf32>
    %117 = arith.mulf %112, %116 : vector<16x32xf32>
    %118 = vector.broadcast %49 : vector<1x32xf32> to vector<16x32xf32>
    %119 = arith.mulf %117, %118 : vector<16x32xf32>
    %120 = vector.broadcast %50 : vector<1x32xf32> to vector<16x32xf32>
    %121 = arith.addf %119, %120 : vector<16x32xf32>
    %122 = arith.truncf %121 : vector<16x32xf32> to vector<16x32xbf16>
    %123 = vector.extract_strided_slice %42 {offsets = [0, 256], sizes = [32, 64], strides = [1, 1]} : vector<32x512xbf16> to vector<32x64xbf16>
    %cst_35 = arith.constant dense<0.000000e+00> : vector<16x64xf32>
    %124 = tpu.matmul %122, %123, %cst_35 {dimension_numbers = #tpu.dot_dimension_numbers<[1], [0], [0], [1], [0, 0, 1, 1], [], []>} : vector<16x32xbf16>, vector<32x64xbf16>, vector<16x64xf32> -> vector<16x64xf32>
    %125 = vector.broadcast %47 : vector<1x64xf32> to vector<16x64xf32>
    %126 = arith.addf %124, %125 : vector<16x64xf32>
    %127 = arith.mulf %126, %126 : vector<16x64xf32>
    %128 = arith.mulf %126, %127 : vector<16x64xf32>
    %cst_36 = arith.constant 4.471500e-02 : f32
    %129 = vector.broadcast %cst_36 : f32 to vector<16x64xf32>
    %130 = arith.mulf %129, %128 : vector<16x64xf32>
    %131 = arith.addf %126, %130 : vector<16x64xf32>
    %cst_37 = arith.constant 0.797884583 : f32
    %132 = vector.broadcast %cst_37 : f32 to vector<16x64xf32>
    %133 = arith.mulf %132, %131 : vector<16x64xf32>
    %134 = math.tanh %133 : vector<16x64xf32>
    %cst_38 = arith.constant 1.000000e+00 : f32
    %135 = vector.broadcast %cst_38 : f32 to vector<16x64xf32>
    %136 = arith.addf %135, %134 : vector<16x64xf32>
    %cst_39 = arith.constant 5.000000e-01 : f32
    %137 = vector.broadcast %cst_39 : f32 to vector<16x64xf32>
    %138 = arith.mulf %137, %136 : vector<16x64xf32>
    %139 = arith.mulf %126, %138 : vector<16x64xf32>
    %140 = arith.truncf %139 : vector<16x64xf32> to vector<16x64xbf16>
    %141 = vector.extract_strided_slice %42 {offsets = [0, 384], sizes = [32, 64], strides = [1, 1]} : vector<32x512xbf16> to vector<32x64xbf16>
    %cst_40 = arith.constant dense<0.000000e+00> : vector<16x32xf32>
    %142 = tpu.matmul %140, %141, %cst_40 {dimension_numbers = #tpu.dot_dimension_numbers<[1], [1], [0], [0], [0, 0, 1, 0], [], []>} : vector<16x64xbf16>, vector<32x64xbf16>, vector<16x32xf32> -> vector<16x32xf32>
    %143 = vector.broadcast %48 : vector<1x32xf32> to vector<16x32xf32>
    %144 = arith.addf %142, %143 : vector<16x32xf32>
    %145 = arith.addf %121, %144 : vector<16x32xf32>
    %cst_41 = arith.constant dense<0.000000e+00> : vector<16xf32>
    %146 = vector.multi_reduction <add>, %145, %cst_41 [1] : vector<16x32xf32> to vector<16xf32>
    %147 = vector.shape_cast %146 : vector<16xf32> to vector<16x1xf32>
    %cst_42 = arith.constant 3.200000e+01 : f32
    %148 = vector.broadcast %cst_42 : f32 to vector<16x1xf32>
    %149 = arith.divf %147, %148 : vector<16x1xf32>
    %150 = vector.broadcast %149 : vector<16x1xf32> to vector<16x32xf32>
    %151 = arith.subf %145, %150 : vector<16x32xf32>
    %152 = arith.mulf %151, %151 : vector<16x32xf32>
    %cst_43 = arith.constant dense<0.000000e+00> : vector<16xf32>
    %153 = vector.multi_reduction <add>, %152, %cst_43 [1] : vector<16x32xf32> to vector<16xf32>
    %154 = vector.shape_cast %153 : vector<16xf32> to vector<16x1xf32>
    %cst_44 = arith.constant 3.200000e+01 : f32
    %155 = vector.broadcast %cst_44 : f32 to vector<16x1xf32>
    %156 = arith.divf %154, %155 : vector<16x1xf32>
    %157 = vector.broadcast %149 : vector<16x1xf32> to vector<16x32xf32>
    %158 = arith.subf %145, %157 : vector<16x32xf32>
    %cst_45 = arith.constant 9.99999996E-13 : f32
    %159 = vector.broadcast %cst_45 : f32 to vector<16x1xf32>
    %160 = arith.addf %156, %159 : vector<16x1xf32>
    %161 = math.rsqrt %160 : vector<16x1xf32>
    %162 = vector.broadcast %161 : vector<16x1xf32> to vector<16x32xf32>
    %163 = arith.mulf %158, %162 : vector<16x32xf32>
    %164 = vector.broadcast %51 : vector<1x32xf32> to vector<16x32xf32>
    %165 = arith.mulf %163, %164 : vector<16x32xf32>
    %166 = vector.broadcast %52 : vector<1x32xf32> to vector<16x32xf32>
    %167 = arith.addf %165, %166 : vector<16x32xf32>
    %c1_46 = arith.constant 1 : index
    %c0_47 = arith.constant 0 : index
    %c0_48 = arith.constant 0 : index
    %168 = vector.load %arg5[%c1_46, %c0_47, %c0_48] : memref<2x32x512xbf16, #tpu.memory_space<vmem>>, vector<1x32x512xbf16>
    %169 = vector.shape_cast %168 : vector<1x32x512xbf16> to vector<32x512xbf16>
    %c1_49 = arith.constant 1 : index
    %c0_50 = arith.constant 0 : index
    %c0_51 = arith.constant 0 : index
    %170 = vector.load %arg6[%c1_49, %c0_50, %c0_51] : memref<2x8x128xf32, #tpu.memory_space<vmem>>, vector<1x8x128xf32>
    %171 = vector.shape_cast %170 : vector<1x8x128xf32> to vector<8x128xf32>
    %172 = vector.extract_strided_slice %171 {offsets = [0, 0], sizes = [1, 96], strides = [1, 1]} : vector<8x128xf32> to vector<1x96xf32>
    %173 = vector.extract_strided_slice %171 {offsets = [1, 0], sizes = [1, 32], strides = [1, 1]} : vector<8x128xf32> to vector<1x32xf32>
    %174 = vector.extract_strided_slice %171 {offsets = [2, 0], sizes = [1, 64], strides = [1, 1]} : vector<8x128xf32> to vector<1x64xf32>
    %175 = vector.extract_strided_slice %171 {offsets = [3, 0], sizes = [1, 32], strides = [1, 1]} : vector<8x128xf32> to vector<1x32xf32>
    %176 = vector.extract_strided_slice %171 {offsets = [4, 0], sizes = [1, 32], strides = [1, 1]} : vector<8x128xf32> to vector<1x32xf32>
    %177 = vector.extract_strided_slice %171 {offsets = [5, 0], sizes = [1, 32], strides = [1, 1]} : vector<8x128xf32> to vector<1x32xf32>
    %178 = vector.extract_strided_slice %171 {offsets = [6, 0], sizes = [1, 32], strides = [1, 1]} : vector<8x128xf32> to vector<1x32xf32>
    %179 = vector.extract_strided_slice %171 {offsets = [7, 0], sizes = [1, 32], strides = [1, 1]} : vector<8x128xf32> to vector<1x32xf32>
    %180 = arith.truncf %167 : vector<16x32xf32> to vector<16x32xbf16>
    %181 = vector.extract_strided_slice %169 {offsets = [0, 0], sizes = [32, 96], strides = [1, 1]} : vector<32x512xbf16> to vector<32x96xbf16>
    %cst_52 = arith.constant dense<0.000000e+00> : vector<16x96xf32>
    %182 = tpu.matmul %180, %181, %cst_52 {dimension_numbers = #tpu.dot_dimension_numbers<[1], [0], [0], [1], [0, 0, 1, 1], [], []>} : vector<16x32xbf16>, vector<32x96xbf16>, vector<16x96xf32> -> vector<16x96xf32>
    %183 = vector.broadcast %172 : vector<1x96xf32> to vector<16x96xf32>
    %184 = arith.addf %182, %183 : vector<16x96xf32>
    %185 = arith.truncf %184 : vector<16x96xf32> to vector<16x96xbf16>
    %186 = vector.extract_strided_slice %185 {offsets = [0, 0], sizes = [16, 16], strides = [1, 1]} : vector<16x96xbf16> to vector<16x16xbf16>
    %187 = vector.shape_cast %186 : vector<16x16xbf16> to vector<2x8x16xbf16>
    %188 = vector.extract_strided_slice %185 {offsets = [0, 16], sizes = [16, 16], strides = [1, 1]} : vector<16x96xbf16> to vector<16x16xbf16>
    %189 = vector.shape_cast %188 : vector<16x16xbf16> to vector<2x8x16xbf16>
    %190 = tpu.concatenate %187, %189 in 0 : vector<2x8x16xbf16>, vector<2x8x16xbf16> -> vector<4x8x16xbf16>
    %191 = vector.extract_strided_slice %185 {offsets = [0, 32], sizes = [16, 16], strides = [1, 1]} : vector<16x96xbf16> to vector<16x16xbf16>
    %192 = vector.shape_cast %191 : vector<16x16xbf16> to vector<2x8x16xbf16>
    %193 = vector.extract_strided_slice %185 {offsets = [0, 48], sizes = [16, 16], strides = [1, 1]} : vector<16x96xbf16> to vector<16x16xbf16>
    %194 = vector.shape_cast %193 : vector<16x16xbf16> to vector<2x8x16xbf16>
    %195 = tpu.concatenate %192, %194 in 0 : vector<2x8x16xbf16>, vector<2x8x16xbf16> -> vector<4x8x16xbf16>
    %196 = vector.extract_strided_slice %185 {offsets = [0, 64], sizes = [16, 16], strides = [1, 1]} : vector<16x96xbf16> to vector<16x16xbf16>
    %197 = vector.shape_cast %196 : vector<16x16xbf16> to vector<2x8x16xbf16>
    %198 = vector.extract_strided_slice %185 {offsets = [0, 80], sizes = [16, 16], strides = [1, 1]} : vector<16x96xbf16> to vector<16x16xbf16>
    %199 = vector.shape_cast %198 : vector<16x16xbf16> to vector<2x8x16xbf16>
    %200 = tpu.concatenate %197, %199 in 0 : vector<2x8x16xbf16>, vector<2x8x16xbf16> -> vector<4x8x16xbf16>
    "tpu.trace_start"() <{level = 10 : i32, message = "bqd,bkd->bqk"}> : () -> ()
    %cst_53 = arith.constant dense<0.000000e+00> : vector<4x8x8xf32>
    %201 = tpu.matmul %190, %195, %cst_53 {dimension_numbers = #tpu.dot_dimension_numbers<[2], [2], [1], [1], [0, 0, 0, 1, 1, 1], [0], [0]>} : vector<4x8x16xbf16>, vector<4x8x16xbf16>, vector<4x8x8xf32> -> vector<4x8x8xf32>
    "tpu.trace_stop"() : () -> ()
    %202 = vector.broadcast %40 : vector<4x1x8xf32> to vector<4x8x8xf32>
    %203 = arith.addf %201, %202 : vector<4x8x8xf32>
    %cst_54 = arith.constant dense<0xFF800000> : vector<4x8xf32>
    %204 = vector.multi_reduction <maximumf>, %203, %cst_54 [2] : vector<4x8x8xf32> to vector<4x8xf32>
    %205 = vector.shape_cast %204 : vector<4x8xf32> to vector<4x8x1xf32>
    %206 = vector.broadcast %205 : vector<4x8x1xf32> to vector<4x8x8xf32>
    %207 = arith.subf %203, %206 : vector<4x8x8xf32>
    %208 = math.exp %207 : vector<4x8x8xf32>
    %cst_55 = arith.constant dense<0.000000e+00> : vector<4x8xf32>
    %209 = vector.multi_reduction <add>, %208, %cst_55 [2] : vector<4x8x8xf32> to vector<4x8xf32>
    %210 = vector.shape_cast %209 : vector<4x8xf32> to vector<4x8x1xf32>
    %211 = tpu.reciprocal %210 {approx = true} : vector<4x8x1xf32> -> vector<4x8x1xf32>
    %212 = vector.broadcast %211 : vector<4x8x1xf32> to vector<4x8x8xf32>
    %213 = arith.mulf %208, %212 : vector<4x8x8xf32>
    %214 = arith.truncf %213 : vector<4x8x8xf32> to vector<4x8x8xbf16>
    "tpu.trace_start"() <{level = 10 : i32, message = "bqk,bkd->bqd"}> : () -> ()
    %cst_56 = arith.constant dense<0.000000e+00> : vector<4x8x16xf32>
    %215 = tpu.matmul %214, %200, %cst_56 {dimension_numbers = #tpu.dot_dimension_numbers<[2], [1], [1], [2], [0, 0, 0, 1, 1, 2], [0], [0]>} : vector<4x8x8xbf16>, vector<4x8x16xbf16>, vector<4x8x16xf32> -> vector<4x8x16xf32>
    "tpu.trace_stop"() : () -> ()
    %216 = vector.extract_strided_slice %215 {offsets = [0, 0, 0], sizes = [2, 8, 16], strides = [1, 1, 1]} : vector<4x8x16xf32> to vector<2x8x16xf32>
    %217 = vector.shape_cast %216 : vector<2x8x16xf32> to vector<16x16xf32>
    %218 = vector.extract_strided_slice %215 {offsets = [2, 0, 0], sizes = [2, 8, 16], strides = [1, 1, 1]} : vector<4x8x16xf32> to vector<2x8x16xf32>
    %219 = vector.shape_cast %218 : vector<2x8x16xf32> to vector<16x16xf32>
    %220 = tpu.concatenate %217, %219 in 1 : vector<16x16xf32>, vector<16x16xf32> -> vector<16x32xf32>
    %221 = arith.truncf %220 : vector<16x32xf32> to vector<16x32xbf16>
    %222 = vector.extract_strided_slice %169 {offsets = [0, 128], sizes = [32, 32], strides = [1, 1]} : vector<32x512xbf16> to vector<32x32xbf16>
    %cst_57 = arith.constant dense<0.000000e+00> : vector<16x32xf32>
    %223 = tpu.matmul %221, %222, %cst_57 {dimension_numbers = #tpu.dot_dimension_numbers<[1], [0], [0], [1], [0, 0, 1, 1], [], []>} : vector<16x32xbf16>, vector<32x32xbf16>, vector<16x32xf32> -> vector<16x32xf32>
    %224 = vector.broadcast %173 : vector<1x32xf32> to vector<16x32xf32>
    %225 = arith.addf %223, %224 : vector<16x32xf32>
    %226 = arith.addf %167, %225 : vector<16x32xf32>
    %cst_58 = arith.constant dense<0.000000e+00> : vector<16xf32>
    %227 = vector.multi_reduction <add>, %226, %cst_58 [1] : vector<16x32xf32> to vector<16xf32>
    %228 = vector.shape_cast %227 : vector<16xf32> to vector<16x1xf32>
    %cst_59 = arith.constant 3.200000e+01 : f32
    %229 = vector.broadcast %cst_59 : f32 to vector<16x1xf32>
    %230 = arith.divf %228, %229 : vector<16x1xf32>
    %231 = vector.broadcast %230 : vector<16x1xf32> to vector<16x32xf32>
    %232 = arith.subf %226, %231 : vector<16x32xf32>
    %233 = arith.mulf %232, %232 : vector<16x32xf32>
    %cst_60 = arith.constant dense<0.000000e+00> : vector<16xf32>
    %234 = vector.multi_reduction <add>, %233, %cst_60 [1] : vector<16x32xf32> to vector<16xf32>
    %235 = vector.shape_cast %234 : vector<16xf32> to vector<16x1xf32>
    %cst_61 = arith.constant 3.200000e+01 : f32
    %236 = vector.broadcast %cst_61 : f32 to vector<16x1xf32>
    %237 = arith.divf %235, %236 : vector<16x1xf32>
    %238 = vector.broadcast %230 : vector<16x1xf32> to vector<16x32xf32>
    %239 = arith.subf %226, %238 : vector<16x32xf32>
    %cst_62 = arith.constant 9.99999996E-13 : f32
    %240 = vector.broadcast %cst_62 : f32 to vector<16x1xf32>
    %241 = arith.addf %237, %240 : vector<16x1xf32>
    %242 = math.rsqrt %241 : vector<16x1xf32>
    %243 = vector.broadcast %242 : vector<16x1xf32> to vector<16x32xf32>
    %244 = arith.mulf %239, %243 : vector<16x32xf32>
    %245 = vector.broadcast %176 : vector<1x32xf32> to vector<16x32xf32>
    %246 = arith.mulf %244, %245 : vector<16x32xf32>
    %247 = vector.broadcast %177 : vector<1x32xf32> to vector<16x32xf32>
    %248 = arith.addf %246, %247 : vector<16x32xf32>
    %249 = arith.truncf %248 : vector<16x32xf32> to vector<16x32xbf16>
    %250 = vector.extract_strided_slice %169 {offsets = [0, 256], sizes = [32, 64], strides = [1, 1]} : vector<32x512xbf16> to vector<32x64xbf16>
    %cst_63 = arith.constant dense<0.000000e+00> : vector<16x64xf32>
    %251 = tpu.matmul %249, %250, %cst_63 {dimension_numbers = #tpu.dot_dimension_numbers<[1], [0], [0], [1], [0, 0, 1, 1], [], []>} : vector<16x32xbf16>, vector<32x64xbf16>, vector<16x64xf32> -> vector<16x64xf32>
    %252 = vector.broadcast %174 : vector<1x64xf32> to vector<16x64xf32>
    %253 = arith.addf %251, %252 : vector<16x64xf32>
    %254 = arith.mulf %253, %253 : vector<16x64xf32>
    %255 = arith.mulf %253, %254 : vector<16x64xf32>
    %cst_64 = arith.constant 4.471500e-02 : f32
    %256 = vector.broadcast %cst_64 : f32 to vector<16x64xf32>
    %257 = arith.mulf %256, %255 : vector<16x64xf32>
    %258 = arith.addf %253, %257 : vector<16x64xf32>
    %cst_65 = arith.constant 0.797884583 : f32
    %259 = vector.broadcast %cst_65 : f32 to vector<16x64xf32>
    %260 = arith.mulf %259, %258 : vector<16x64xf32>
    %261 = math.tanh %260 : vector<16x64xf32>
    %cst_66 = arith.constant 1.000000e+00 : f32
    %262 = vector.broadcast %cst_66 : f32 to vector<16x64xf32>
    %263 = arith.addf %262, %261 : vector<16x64xf32>
    %cst_67 = arith.constant 5.000000e-01 : f32
    %264 = vector.broadcast %cst_67 : f32 to vector<16x64xf32>
    %265 = arith.mulf %264, %263 : vector<16x64xf32>
    %266 = arith.mulf %253, %265 : vector<16x64xf32>
    %267 = arith.truncf %266 : vector<16x64xf32> to vector<16x64xbf16>
    %268 = vector.extract_strided_slice %169 {offsets = [0, 384], sizes = [32, 64], strides = [1, 1]} : vector<32x512xbf16> to vector<32x64xbf16>
    %cst_68 = arith.constant dense<0.000000e+00> : vector<16x32xf32>
    %269 = tpu.matmul %267, %268, %cst_68 {dimension_numbers = #tpu.dot_dimension_numbers<[1], [1], [0], [0], [0, 0, 1, 0], [], []>} : vector<16x64xbf16>, vector<32x64xbf16>, vector<16x32xf32> -> vector<16x32xf32>
    %270 = vector.broadcast %175 : vector<1x32xf32> to vector<16x32xf32>
    %271 = arith.addf %269, %270 : vector<16x32xf32>
    %272 = arith.addf %248, %271 : vector<16x32xf32>
    %cst_69 = arith.constant dense<0.000000e+00> : vector<16xf32>
    %273 = vector.multi_reduction <add>, %272, %cst_69 [1] : vector<16x32xf32> to vector<16xf32>
    %274 = vector.shape_cast %273 : vector<16xf32> to vector<16x1xf32>
    %cst_70 = arith.constant 3.200000e+01 : f32
    %275 = vector.broadcast %cst_70 : f32 to vector<16x1xf32>
    %276 = arith.divf %274, %275 : vector<16x1xf32>
    %277 = vector.broadcast %276 : vector<16x1xf32> to vector<16x32xf32>
    %278 = arith.subf %272, %277 : vector<16x32xf32>
    %279 = arith.mulf %278, %278 : vector<16x32xf32>
    %cst_71 = arith.constant dense<0.000000e+00> : vector<16xf32>
    %280 = vector.multi_reduction <add>, %279, %cst_71 [1] : vector<16x32xf32> to vector<16xf32>
    %281 = vector.shape_cast %280 : vector<16xf32> to vector<16x1xf32>
    %cst_72 = arith.constant 3.200000e+01 : f32
    %282 = vector.broadcast %cst_72 : f32 to vector<16x1xf32>
    %283 = arith.divf %281, %282 : vector<16x1xf32>
    %284 = vector.broadcast %276 : vector<16x1xf32> to vector<16x32xf32>
    %285 = arith.subf %272, %284 : vector<16x32xf32>
    %cst_73 = arith.constant 9.99999996E-13 : f32
    %286 = vector.broadcast %cst_73 : f32 to vector<16x1xf32>
    %287 = arith.addf %283, %286 : vector<16x1xf32>
    %288 = math.rsqrt %287 : vector<16x1xf32>
    %289 = vector.broadcast %288 : vector<16x1xf32> to vector<16x32xf32>
    %290 = arith.mulf %285, %289 : vector<16x32xf32>
    %291 = vector.broadcast %178 : vector<1x32xf32> to vector<16x32xf32>
    %292 = arith.mulf %290, %291 : vector<16x32xf32>
    %293 = vector.broadcast %179 : vector<1x32xf32> to vector<16x32xf32>
    %294 = arith.addf %292, %293 : vector<16x32xf32>
    %c0_74 = arith.constant 0 : index
    %c0_75 = arith.constant 0 : index
    %295 = vector.load %arg8[%c0_74, %c0_75] : memref<16x32xf32, #tpu.memory_space<vmem>>, vector<16x32xf32>
    tpu.vector_store %arg8[%c0_74, %c0_75], %294 {strides = array<i32>} : memref<16x32xf32, #tpu.memory_space<vmem>>, vector<16x32xf32>,
    %c0_76 = arith.constant 0 : index
    %c0_77 = arith.constant 0 : index
    %296 = tpu.strided_load %arg8[%c0_76, %c0_77] {strides = array<i32: 8, 1>} : memref<16x32xf32, #tpu.memory_space<vmem>>, vector<2x32xf32>
    %c0_78 = arith.constant 0 : index
    %c0_79 = arith.constant 0 : index
    %297 = vector.load %arg7[%c0_78, %c0_79] : memref<2x32xf32, #tpu.memory_space<vmem>>, vector<2x32xf32>
    tpu.vector_store %arg7[%c0_78, %c0_79], %296 {strides = array<i32>} : memref<2x32xf32, #tpu.memory_space<vmem>>, vector<2x32xf32>,
    return
  }
}

</mosaic_0001>

<bundles_post_ra>
// kernel: text_encoder_forward.1
= control target key start
LH: loop header
LB: loop body
LE: loop exit
PB: predicated region body
PF: predicated region fallthrough
CT: control target
= control target key end

     0   :  { %v2326_v2 = vmov 0   ;;  %s2829_s0 = inlined_call_operand.vmem [shape: s32[16,1], index: 0, kind: input, shape index: {}]   ;;  %s2830_s1 = inlined_call_operand.vmem [shape: s32[2,1,8], index: 1, kind: input, shape index: {}]   ;;  %s2831_s2 = inlined_call_operand.vmem [shape: f32[128,32], index: 2, kind: input, shape index: {}]   ;;  %s2832_s3 = inlined_call_operand.vmem [shape: f32[16,32], index: 3, kind: input, shape index: {}]   ;;  %s2833_s4 = inlined_call_operand.vmem [shape: f32[2,32], index: 4, kind: input, shape index: {}]   ;;  %s2834_s5 = inlined_call_operand.vmem [shape: bf16[2,32,512], index: 5, kind: input, shape index: {}]   ;;  %s2835_s6 = inlined_call_operand.vmem [shape: f32[2,8,128], index: 6, kind: input, shape index: {}]   ;;  %s2836_s7 = inlined_call_operand.hbm [shape: f32[2,32], index: 7, kind: output, shape index: {}]  }
   0x1   :  { %v28_v0 = vld [vmem:[%s2829_s0] sm:$0xff]  ;;  %2207 = vset.pattern.permute.xlu0 %v2326_v2  ;;  %v45_v3 = vld [vmem:[%s2831_s2 + $0x8] sm:$0xff]  ;;  %v46_v4 = vld [vmem:[%s2831_s2 + $0x10] sm:$0xff] }
   0x2   :  { %v44_v1 = vld [vmem:[%s2831_s2] sm:$0xff]  ;;  %v47_v5 = vld [vmem:[%s2831_s2 + $0x18] sm:$0xff]  ;;  %33 = vperm.xlu0 %2207, %v28_v0   ;;  %v29_v8 = vld [vmem:[%s2829_s0 + $0x8] sm:$0xff] }
   0x3   :  { %v2166_v6 = vpack.c.bf16 %v45_v3, %v44_v1  ;;  %v2170_v7 = vpack.c.bf16 %v47_v5, %v46_v4  ;;  %v48_v9 = vld [vmem:[%s2831_s2 + $0x20] sm:$0xff]  ;;  %v49_v10 = vld [vmem:[%s2831_s2 + $0x28] sm:$0xff]  ;;  %v50_v11 = vld [vmem:[%s2831_s2 + $0x30] sm:$0xff] }
   0x4   :  { %v2174_v12 = vpack.c.bf16 %v49_v10, %v48_v9  ;;  %v51_v13 = vld [vmem:[%s2831_s2 + $0x38] sm:$0xff]  ;;  %v52_v14 = vld [vmem:[%s2831_s2 + $0x40] sm:$0xff]  ;;  %v53_v15 = vld [vmem:[%s2831_s2 + $0x48] sm:$0xff] }
   0x5   :  { %2167 = vmatprep.subr.bf16.mxu0 %v2166_v6  ;;  %v2178_v16 = vpack.c.bf16 %v51_v13, %v50_v11 }
   0x6   :  { %2169 = vmatpush3.bf16.msra.mxu0 %v2166_v6  ;;  %36 = vperm.xlu0 %2207, %v29_v8  }
   0x7   :  { %2171 = vmatprep.subr.bf16.mxu0 %v2170_v7 }
   0xa   :  { %2173 = vmatpush3.bf16.msra.mxu0 %v2170_v7 }
   0xb   :  { %2175 = vmatprep.subr.bf16.mxu0 %v2174_v12 }
   0xc   :  { %12 = vsyncpa [#allocation4], 0  ;;  %v2182_v17 = vpack.c.bf16 %v53_v15, %v52_v14  ;;  %v54_v18 = vld [vmem:[%s2831_s2 + $0x50] sm:$0xff]  ;;  %v55_v19 = vld [vmem:[%s2831_s2 + $0x58] sm:$0xff]  ;;  %v30_v27 = vlaneseq  ;;  %v2327_v30 = vmov 1.0   ;;  %vm139_vm2 = vcmask 261120  }
   0xd   :  { %v2186_v20 = vpack.c.bf16 %v55_v19, %v54_v18  ;;  %v56_v21 = vld [vmem:[%s2831_s2 + $0x60] sm:$0xff]  ;;  %v57_v22 = vld [vmem:[%s2831_s2 + $0x68] sm:$0xff]  ;;  %v58_v24 = vld [vmem:[%s2831_s2 + $0x70] sm:$0xff]  ;;  %v2328_v51 = vmov 0.0   ;;  %vm2329_vm3 = vmmov 0   ;;  %s2330_s23 = smov 112  }
   0xe   :  { %2177 = vmatpush3.bf16.msra.mxu0 %v2174_v12  ;;  %v2190_v23 = vpack.c.bf16 %v57_v22, %v56_v21  ;;  %v59_v25 = vld [vmem:[%s2831_s2 + $0x78] sm:$0xff]  ;;  %v31_v28 = vand.u32 127, %v30_v27  ;;  %v60_v32 = vld [vmem:[%s2832_s3] sm:$0xff]  ;;  %v61_v34 = vld [vmem:[%s2832_s3 + $0x8] sm:$0xff]  ;;  %2006 = vmatprep.subr.bf16.mxu1 %v2328_v51  ;;  %v2470_v6 = vshrl.u32 %v30_v27, 7  ;;  %s2331_s24 = smov 96  }
   0xf   :  { %2179 = vmatprep.subr.bf16.mxu0 %v2178_v16  ;;  %v2194_v26 = vpack.c.bf16 %v59_v25, %v58_v24  ;;  %v2218_v50 = vld [vmem:[%s2834_s5] ss:$16 sps:$4 sm:$0xff]   ;;  %2010 = vmatprep.mubr.msk.bf16.mxu1 %vm2329_vm3, %v2328_v51  ;;  %vm281_vm4 = vcmask 130048   ;;  %vm476_vm5 = vcmask 64512   ;;  %vm530_vm6 = vcmask 1043456   ;;  %s2333_s10 = smov 16  }
  0x10   :  { %2007 = vmatpush3.bf16.msra.mxu1 %v2218_v50  ;;  %v2221_v52 = vld [vmem:[%s2834_s5 + $0x20] ss:$16 sps:$4 sm:$0xff]   ;;  %v2473_v7 = vsub.s32 0, %v2470_v6  ;;  %vm915_vm7 = vcmask 523264   ;;  %vm1814_vm8 = vcmask 254976  }
  0x11   :  { %2008 = vmatprep.subr.bf16.mxu1 %v2328_v51  ;;  %v1834_v61 = vld [vmem:[%s2833_s4] ss:$0 sm:$0xff]  ;;  %v1835_v1 = vld [vmem:[%s2833_s4 + $0x1] ss:$0 sm:$0xff] }
  0x12   :  { %2181 = vmatpush3.bf16.msra.mxu0 %v2178_v16  ;;  %v2478_v8 = vld [vmem:[%s2835_s6] sm:$0xff] }
  0x13   :  { %2183 = vmatprep.subr.bf16.mxu0 %v2182_v17  ;;  %v200_v9 = vrot.slane %v2478_v8, %v2473_v7 }
  0x14   :  { %2009 = vmatpush3.bf16.msra.mxu1 %v2221_v52 }
  0x15   :  { %2014 = vmatprep.subr.bf16.mxu1 %v2328_v51 }
  0x16   :  { %2185 = vmatpush3.bf16.msra.mxu0 %v2182_v17 }
  0x17   :  { %2187 = vmatprep.subr.bf16.mxu0 %v2186_v20 }
  0x1a   :  { %2189 = vmatpush3.bf16.msra.mxu0 %v2186_v20 }
  0x1b   :  { %2191 = vmatprep.subr.bf16.mxu0 %v2190_v23 }
  0x1e   :  { %2193 = vmatpush3.bf16.msra.mxu0 %v2190_v23 }
  0x1f   :  { %2195 = vmatprep.subr.bf16.mxu0 %v2194_v26 }
  0x22   :  { %2197 = vmatpush3.bf16.msra.mxu0 %v2194_v26 }
  0x23   :  { %2044 = vmatprep.subr.bf16.mxu0 %v2328_v51 }
  0x81   :  { %v34_v29 = vpop.permute.xlu0 %33 }
  0x82   :  { %vm38_vm0 = vcmp.eq.s32.totalorder %v31_v28, %v34_v29 }
  0x83   :  { %2003 = vmatprep.mubr.msk.f32.mxu0 %vm38_vm0, %v2327_v30 }
  0x85   :  { %v37_v31 = vpop.permute.xlu0 %36 }
  0x86   :  { %vm39_vm1 = vcmp.eq.s32.totalorder %v31_v28, %v37_v31 }
  0x87   :  { %2004 = vmatmul.mubr.msk.f32.vlgmr.msra.gmra.mrb[0].mxu0 %vm39_vm1, %v2327_v30  ;;  %v179_v30 = vld [vmem:[%s2830_s1] sm:$0x1] }
  0x88   :  { %2046 = vmatprep.mubr.msk.bf16.mxu0 %vm2329_vm3, %v2328_v51  ;;  %v181_v31 = vcvt.s32.f32 %v179_v30 }
 0x15a   :  { %v2005_v33 = vpop.f32.mrb[0].mxu0 }
 0x15b   :  { %v128_v35 = vpop.f32.mrb[1].mxu0  ;;  %v134_v37 = vadd.f32 %v2005_v33, %v61_v34  ;;  %v180_v33 = vld [vmem:[%s2830_s1 + $0x1] sm:$0x1]  ;;  %s2332_s1 = smov 64  }
 0x15c   :  { %v129_v36 = vadd.f32 %v128_v35, %v60_v32  ;;  %v183_v32 = vsub.f32 1.0, %v181_v31  ;;  %v182_v35 = vcvt.s32.f32 %v180_v33 }
 0x15d   :  { %v143_v39 = vsel %vm139_vm2, %v134_v37, 0.0 }
 0x15e   :  { %v140_v38 = vsel %vm139_vm2, %v129_v36, 0.0  ;;  %v185_v34 = vmul.f32 -1e+09, %v183_v32 }
 0x15f   :  { %141 = vadd.xlane.f32.xlu1 %v140_v38 }
 0x163   :  { %144 = vadd.xlane.f32.xlu1 %v143_v39 }
 0x1ec   :  { %v142_v40 = vpop.xlane.xlu1 %141 }
 0x1ed   :  { %v147_v41 = vmul.f32 0.03125, %v142_v40 }
 0x1ef   :  { %v149_v42 = vsub.f32 %v129_v36, %v147_v41  ;;  %v2531_v36 = vrot.slane %v185_v34, %v2473_v7 }
 0x1f0   :  { %v145_v43 = vpop.xlane.xlu1 %144 }
 0x1f1   :  { %v148_v44 = vmul.f32 0.03125, %v145_v43  ;;  %v151_v45 = vmul.f32 %v149_v42, %v149_v42 }
 0x1f3   :  { %v150_v46 = vsub.f32 %v134_v37, %v148_v44  ;;  %v153_v47 = vsel %vm139_vm2, %v151_v45, 0.0  ;;  %v184_v37 = vsub.f32 1.0, %v182_v35 }
 0x1f4   :  { %154 = vadd.xlane.f32.xlu0 %v153_v47 }
 0x1f5   :  { %v152_v48 = vmul.f32 %v150_v46, %v150_v46  ;;  %v186_v41 = vmul.f32 -1e+09, %v184_v37 }
 0x1f7   :  { %v156_v49 = vsel %vm139_vm2, %v152_v48, 0.0  ;;  %v2536_v45 = vrot.slane %v186_v41, %v2473_v7 }
 0x1f8   :  { %157 = vadd.xlane.f32.xlu1 %v156_v49 }
 0x281   :  { %v155_v53 = vpop.xlane.xlu0 %154 }
 0x282   :  { %v159_v54 = vmul.f32 0.03125, %v155_v53 }
 0x284   :  { %v161_v55 = vadd.f32 1e-12, %v159_v54 }
 0x285   :  { %v158_v56 = vpop.xlane.xlu1 %157 }
 0x286   :  { %2242 = vrsqrt.f32 %v161_v55  ;;  %v160_v57 = vmul.f32 0.03125, %v158_v56 }
 0x288   :  { %v162_v58 = vadd.f32 1e-12, %v160_v57 }
 0x28a   :  { %2244 = vrsqrt.f32 %v162_v58 }
 0x290   :  { %v2243_v59 = vpop.eup %2242 }
 0x291   :  { %v165_v60 = vmul.f32 %v2243_v59, %v149_v42 }
 0x293   :  { %v171_v0 = vmul.f32 %v1834_v61, %v165_v60 }
 0x294   :  { %v2245_v62 = vpop.eup %2244 }
 0x295   :  { %v166_v63 = vmul.f32 %v2245_v62, %v150_v46  ;;  %v2460_v3 = vadd.f32 %v1835_v1, %v171_v0 }
 0x297   :  { %v172_v2 = vmul.f32 %v1834_v61, %v166_v63 }
 0x299   :  { %v2462_v4 = vadd.f32 %v1835_v1, %v172_v2 }
 0x29b   :  { %v196_v5 = vpack.c.bf16 %v2462_v4, %v2460_v3 }
 0x29d   :  { %2011 = vmatmul.mubr.msk.bf16.vlgmr.msra.gmra.mrb[0].mxu1 %vm139_vm2, %v196_v5 }
 0x29e   :  { %2016 = vmatprep.mubr.msk.bf16.mxu1 %vm2329_vm3, %v2328_v51 }
 0x370   :  { %v250_v10 = vpop.f32.mrb[0].mxu1 }
 0x371   :  { %v251_v11 = vadd.f32 %v250_v10, %v200_v9  ;;  %v2012_v12 = vpop.f32.mrb[1].mxu1 }
 0x372   :  { %v253_v13 = vpop.f32.mrb[2].mxu1 }
 0x373   :  { %v2482_v14 = vpack.c.bf16 %v251_v11, %v251_v11  ;;  %v254_v15 = vadd.f32 %v253_v13, %v200_v9  ;;  %v2013_v16 = vpop.f32.mrb[3].mxu1 }
 0x375   :  { %263 = vrot.lane.b32.xlu1 %v2482_v14, %s2330_s23  ;;  %v2486_v17 = vpack.c.bf16 %v254_v15, %v254_v15 }
 0x379   :  { %265 = vrot.lane.b32.xlu1 %v2486_v17, %s2330_s23 }
 0x37d   :  { %279 = vrot.lane.b32.xlu1 %v2482_v14, %s2331_s24 }
 0x381   :  { %328 = vrot.lane.b32.xlu1 %v2486_v17, %s2331_s24 }
 0x3e7   :  { %v264_v18 = vpop.permute.xlu1 %263 }
 0x3e8   :  { %v2494_v19 = vcombine.low %v264_v18, %v264_v18 }
 0x3ea   :  { %378 = vrot.lane.b32.xlu0 %v2494_v19, %s2331_s24 }
 0x3eb   :  { %v266_v20 = vpop.permute.xlu1 %265 }
 0x3ec   :  { %v2498_v21 = vcombine.low %v266_v20, %v266_v20 }
 0x3ee   :  { %428 = vrot.lane.b32.xlu1 %v2498_v21, %s2331_s24 }
 0x3ef   :  { %v280_v22 = vpop.permute.xlu1 %279 }
 0x3f0   :  { %v286_v23 = vsel %vm281_vm4, %v280_v22, 0 }
 0x3f1   :  { %2015 = vmatpush3.bf16.xpose.msra.mxu1 %v286_v23 }
 0x3f2   :  { %2020 = vmatprep.subr.bf16.mxu1 %v2328_v51 }
 0x3f3   :  { %v329_v24 = vpop.permute.xlu1 %328 }
 0x3f4   :  { %v334_v25 = vsel %vm281_vm4, %v329_v24, 0 }
 0x3f8   :  { %2017 = vmatmul.mubr.msk.bf16.vlgmr.msra.gmra.mrb[4].mxu1 %vm281_vm4, %v2482_v14 }
 0x3f9   :  { %2021 = vmatpush3.bf16.xpose.msra.mxu1 %v334_v25  ;;  %2022 = vmatprep.mubr.msk.bf16.mxu1 %vm2329_vm3, %v2328_v51 }
 0x3fa   :  { %2026 = vmatprep.subr.bf16.mxu1 %v2328_v51 }
 0x400   :  { %2023 = vmatmul.mubr.msk.bf16.vlgmr.msra.gmra.mrb[8].mxu1 %vm281_vm4, %v2486_v17 }
 0x401   :  { %2028 = vmatprep.mubr.msk.bf16.mxu1 %vm2329_vm3, %v2328_v51 }
 0x45c   :  { %v379_v26 = vpop.permute.xlu0 %378 }
 0x45d   :  { %v384_v27 = vsel %vm281_vm4, %v379_v26, 0 }
 0x45e   :  { %2027 = vmatpush3.bf16.xpose.msra.mxu1 %v384_v27 }
 0x45f   :  { %2032 = vmatprep.subr.bf16.mxu1 %v2328_v51 }
 0x460   :  { %v429_v28 = vpop.permute.xlu1 %428 }
 0x461   :  { %v434_v29 = vsel %vm281_vm4, %v429_v28, 0 }
 0x465   :  { %2029 = vmatmul.mubr.msk.bf16.vlgmr.msra.gmra.mrb[12].mxu1 %vm281_vm4, %v264_v18 }
 0x466   :  { %2033 = vmatpush3.bf16.xpose.msra.mxu1 %v434_v29  ;;  %2034 = vmatprep.mubr.msk.bf16.mxu1 %vm2329_vm3, %v2328_v51 }
 0x467   :  { %2038 = vmatprep.subr.bf16.mxu1 %v2328_v51 }
 0x46d   :  { %2035 = vmatmul.mubr.msk.bf16.vlgmr.msra.gmra.mrb[16].mxu1 %vm281_vm4, %v266_v20 }
 0x46e   :  { %2040 = vmatprep.mubr.msk.bf16.mxu1 %vm2329_vm3, %v2328_v51 }
 0x4cb   :  { %v322_v38 = vpop.f32.mrb[4].mxu1 }
 0x4cc   :  { %v323_v39 = vadd.f32 %v322_v38, %v2531_v36  ;;  %v2018_v40 = vpop.f32.mrb[5].mxu1 }
 0x4cd   :  { %v325_v42 = vpop.f32.mrb[6].mxu1 }
 0x4ce   :  { %v2019_v43 = vpop.f32.mrb[7].mxu1  ;;  %v477_v44 = vsel %vm476_vm5, %v323_v39, -inf }
 0x4cf   :  { %478 = vmax.xlane.f32.xlu1 %v477_v44  ;;  %v2220_v43 = vld [vmem:[%s2834_s5 + $0x4] ss:$16 sps:$4 sm:$0xff]  }
 0x4d3   :  { %v370_v46 = vpop.f32.mrb[8].mxu1 }
 0x4d4   :  { %v371_v47 = vadd.f32 %v370_v46, %v2536_v45  ;;  %v2024_v48 = vpop.f32.mrb[9].mxu1 }
 0x4d5   :  { %v373_v49 = vpop.f32.mrb[10].mxu1 }
 0x4d6   :  { %v2025_v50 = vpop.f32.mrb[11].mxu1  ;;  %v480_v52 = vsel %vm476_vm5, %v371_v47, -inf  ;;  %v2223_v49 = vld [vmem:[%s2834_s5 + $0x24] ss:$16 sps:$4 sm:$0xff]  }
 0x4d7   :  { %481 = vmax.xlane.f32.xlu0 %v480_v52 }
 0x538   :  { %v420_v53 = vpop.f32.mrb[12].mxu1 }
 0x539   :  { %v421_v54 = vadd.f32 %v420_v53, %v2531_v36  ;;  %v2030_v55 = vpop.f32.mrb[13].mxu1 }
 0x53a   :  { %v423_v56 = vpop.f32.mrb[14].mxu1 }
 0x53b   :  { %v2031_v57 = vpop.f32.mrb[15].mxu1  ;;  %v483_v58 = vsel %vm476_vm5, %v421_v54, -inf }
 0x53c   :  { %484 = vmax.xlane.f32.xlu1 %v483_v58 }
 0x540   :  { %v470_v59 = vpop.f32.mrb[16].mxu1 }
 0x541   :  { %v471_v60 = vadd.f32 %v470_v59, %v2536_v45  ;;  %v2036_v61 = vpop.f32.mrb[17].mxu1 }
 0x542   :  { %v473_v62 = vpop.f32.mrb[18].mxu1 }
 0x543   :  { %v2037_v63 = vpop.f32.mrb[19].mxu1  ;;  %v486_v0 = vsel %vm476_vm5, %v471_v60, -inf }
 0x544   :  { %487 = vmax.xlane.f32.xlu1 %v486_v0 }
 0x555   :  { %525 = vrot.lane.b32.xlu1 %v2482_v14, %s2332_s1 }
 0x55c   :  { %v479_v1 = vpop.xlane.xlu1 %478 }
 0x55d   :  { %v489_v2 = vsub.f32 %v323_v39, %v479_v1 }
 0x55f   :  { %v493_v10 = vmul.f32 1.442695, %v489_v2 }
 0x564   :  { %v482_v5 = vpop.xlane.xlu0 %481 }
 0x565   :  { %v490_v9 = vsub.f32 %v371_v47, %v482_v5 }
 0x567   :  { %v495_v11 = vmul.f32 1.442695, %v490_v9 }
 0x569   :  { %2246 = vpow2.f32 %v495_v11 }
 0x56a   :  { %2248 = vpow2.f32 %v493_v10 }
 0x573   :  { %v2247_v12 = vpop.eup %2246 }
 0x574   :  { %v504_v13 = vsel %vm476_vm5, %v2247_v12, 0.0  ;;  %v2249_v15 = vpop.eup %2248 }
 0x575   :  { %505 = vadd.xlane.f32.xlu0 %v504_v13  ;;  %v501_v16 = vsel %vm476_vm5, %v2249_v15, 0.0 }
 0x579   :  { %502 = vadd.xlane.f32.xlu1 %v501_v16 }
 0x5c9   :  { %v485_v18 = vpop.xlane.xlu1 %484 }
 0x5ca   :  { %v491_v20 = vsub.f32 %v421_v54, %v485_v18 }
 0x5cc   :  { %v497_v22 = vmul.f32 1.442695, %v491_v20 }
 0x5ce   :  { %2250 = vpow2.f32 %v497_v22 }
 0x5d1   :  { %v488_v14 = vpop.xlane.xlu1 %487 }
 0x5d2   :  { %v492_v23 = vsub.f32 %v471_v60, %v488_v14  ;;  %v731_v14 = vsub.s32 1, %v2470_v6 }
 0x5d4   :  { %v499_v24 = vmul.f32 1.442695, %v492_v23  ;;  %v732_v23 = vrot.slane %v2478_v8, %v731_v14 }
 0x5d5   :  { %v526_v25 = vpop.permute.xlu1 %525 }
 0x5d6   :  { %2252 = vpow2.f32 %v499_v24  ;;  %v532_v26 = vsel %vm530_vm6, %v526_v25, 0 }
 0x5d7   :  { %2039 = vmatpush3.bf16.msra.mxu1 %v532_v26 }
 0x5d8   :  { %v2251_v27 = vpop.eup %2250  ;;  %2050 = vmatprep.subr.bf16.mxu1 %v2328_v51 }
 0x5d9   :  { %v507_v28 = vsel %vm476_vm5, %v2251_v27, 0.0 }
 0x5da   :  { %508 = vadd.xlane.f32.xlu1 %v507_v28 }
 0x5e0   :  { %v2253_v29 = vpop.eup %2252 }
 0x5e1   :  { %v510_v30 = vsel %vm476_vm5, %v2253_v29, 0.0 }
 0x5e2   :  { %511 = vadd.xlane.f32.xlu0 %v510_v30 }
 0x5eb   :  { %622 = vrot.lane.b32.xlu1 %v2494_v19, %s2332_s1 }
 0x5ef   :  { %670 = vrot.lane.b32.xlu1 %v2498_v21, %s2332_s1 }
 0x5f8   :  { %574 = vrot.lane.b32.xlu0 %v2486_v17, %s2332_s1 }
 0x602   :  { %v506_v35 = vpop.xlane.xlu0 %505 }
 0x606   :  { %v503_v31 = vpop.xlane.xlu1 %502 }
 0x607   :  { %2254 = vrcp.f32 %v503_v31 }
 0x608   :  { %2256 = vrcp.f32 %v506_v35 }
 0x611   :  { %v2255_v32 = vpop.eup %2254 }
 0x612   :  { %v517_v33 = vmul.f32 %v2255_v32, %v2249_v15  ;;  %v2257_v17 = vpop.eup %2256 }
 0x613   :  { %v518_v40 = vmul.f32 %v2257_v17, %v2247_v12 }
 0x614   :  { %v521_v34 = vpack.c.bf16 %v517_v33, %v517_v33 }
 0x615   :  { %v522_v48 = vpack.c.bf16 %v518_v40, %v518_v40 }
 0x616   :  { %2041 = vmatmul.mubr.msk.bf16.vlgmr.msra.gmra.mrb[20].mxu1 %vm476_vm5, %v521_v34 }
 0x617   :  { %2052 = vmatprep.mubr.msk.bf16.mxu1 %vm2329_vm3, %v2328_v51 }
 0x667   :  { %v509_v37 = vpop.xlane.xlu1 %508 }
 0x668   :  { %2258 = vrcp.f32 %v509_v37 }
 0x66b   :  { %v623_v19 = vpop.permute.xlu1 %622 }
 0x66c   :  { %v628_v21 = vsel %vm530_vm6, %v623_v19, 0 }
 0x66d   :  { %2051 = vmatpush3.bf16.msra.mxu1 %v628_v21 }
 0x66e   :  { %2062 = vmatprep.subr.bf16.mxu1 %v2328_v51 }
 0x66f   :  { %v512_v38 = vpop.xlane.xlu0 %511  ;;  %v671_v46 = vpop.permute.xlu1 %670 }
 0x670   :  { %2260 = vrcp.f32 %v512_v38  ;;  %v676_v50 = vsel %vm530_vm6, %v671_v46, 0 }
 0x672   :  { %v2259_v39 = vpop.eup %2258 }
 0x673   :  { %v519_v41 = vmul.f32 %v2259_v39, %v2251_v27  ;;  %v575_v42 = vpop.permute.xlu0 %574 }
 0x674   :  { %v580_v44 = vsel %vm530_vm6, %v575_v42, 0 }
 0x675   :  { %2045 = vmatpush3.bf16.msra.mxu0 %v580_v44  ;;  %v523_v47 = vpack.c.bf16 %v519_v41, %v519_v41  ;;  %v2226_v41 = vld [vmem:[%s2834_s5 + $0x28] ss:$16 sps:$4 sm:$0xff]  }
 0x676   :  { %2056 = vmatprep.subr.bf16.mxu0 %v2328_v51 }
 0x677   :  { %2053 = vmatmul.mubr.msk.bf16.vlgmr.msra.gmra.mrb[24].mxu1 %vm476_vm5, %v523_v47 }
 0x678   :  { %2047 = vmatmul.mubr.msk.bf16.vlgmr.msra.gmra.mrb[4].mxu0 %vm476_vm5, %v522_v48  ;;  %2063 = vmatpush3.bf16.msra.mxu1 %v2220_v43 }
 0x679   :  { %2057 = vmatpush3.bf16.msra.mxu0 %v676_v50  ;;  %2058 = vmatprep.mubr.msk.bf16.mxu0 %vm2329_vm3, %v2328_v51 }
 0x67a   :  { %v2261_v52 = vpop.eup %2260  ;;  %2064 = vmatprep.subr.bf16.mxu1 %v2328_v51  ;;  %2066 = vmatprep.mubr.msk.bf16.mxu1 %vm2329_vm3, %v2328_v51 }
 0x67b   :  { %v520_v53 = vmul.f32 %v2261_v52, %v2253_v29  ;;  %2070 = vmatprep.subr.bf16.mxu0 %v2328_v51  ;;  %v821_v52 = vsub.s32 5, %v2470_v6 }
 0x67c   :  { %2065 = vmatpush3.bf16.msra.mxu1 %v2223_v49  ;;  %v815_v49 = vsub.s32 4, %v2470_v6 }
 0x67d   :  { %v524_v54 = vpack.c.bf16 %v520_v53, %v520_v53  ;;  %2078 = vmatprep.subr.bf16.mxu1 %v2328_v51 }
 0x67e   :  { %v816_v50 = vrot.slane %v2478_v8, %v815_v49 }
 0x680   :  { %2059 = vmatmul.mubr.msk.bf16.vlgmr.msra.gmra.mrb[8].mxu0 %vm476_vm5, %v524_v54 }
 0x681   :  { %2074 = vmatprep.mubr.msk.bf16.mxu0 %vm2329_vm3, %v2328_v51 }
 0x6e9   :  { %v568_v55 = vpop.f32.mrb[20].mxu1 }
 0x6ea   :  { %v2042_v56 = vpop.f32.mrb[21].mxu1 }
 0x6eb   :  { %v571_v57 = vpop.f32.mrb[22].mxu1 }
 0x6ec   :  { %v2043_v58 = vpop.f32.mrb[23].mxu1 }
 0x6ed   :  { %v822_v58 = vrot.slane %v2478_v8, %v821_v52 }
 0x74a   :  { %v664_v59 = vpop.f32.mrb[24].mxu1 }
 0x74b   :  { %v616_v60 = vpop.f32.mrb[4].mxu0  ;;  %v2054_v61 = vpop.f32.mrb[25].mxu1 }
 0x74c   :  { %v2048_v62 = vpop.f32.mrb[5].mxu0  ;;  %v667_v63 = vpop.f32.mrb[26].mxu1 }
 0x74d   :  { %v619_v0 = vpop.f32.mrb[6].mxu0  ;;  %v2055_v1 = vpop.f32.mrb[27].mxu1  ;;  %v2228_v63 = vld [vmem:[%s2834_s5 + $0xc] ss:$16 sps:$4 sm:$0xff]  }
 0x74e   :  { %v2049_v2 = vpop.f32.mrb[7].mxu0  ;;  %v920_v0 = vsel %vm915_vm7, %v2228_v63, 0  ;;  %v2229_v1 = vld [vmem:[%s2834_s5 + $0x2c] ss:$16 sps:$4 sm:$0xff]  }
 0x74f   :  { %v923_v2 = vsel %vm915_vm7, %v2229_v1, 0 }
 0x753   :  { %v712_v5 = vpop.f32.mrb[8].mxu0 }
 0x754   :  { %v2208_v9 = vpack.i.bf16 %v712_v5, %v664_v59  ;;  %v2060_v10 = vpop.f32.mrb[9].mxu0  ;;  %v828_v5 = vsub.s32 2, %v2470_v6 }
 0x755   :  { %v715_v11 = vpop.f32.mrb[10].mxu0 }
 0x756   :  { %v2061_v12 = vpop.f32.mrb[11].mxu0  ;;  %2209 = vrot.lane.b32.xlu0 %v2208_v9, %s2333_s10  ;;  %v829_v9 = vrot.slane %v2478_v8, %v828_v5 }
 0x7c8   :  { %v2210_v13 = vpop.permute.xlu0 %2209 }
 0x7c9   :  { %v2212_v15 = vunpack.i.h.bf16 %v2210_v13  ;;  %v2211_v16 = vunpack.i.l.bf16 %v2210_v13 }
 0x7cb   :  { %v727_v18 = vsel %vm281_vm4, %v616_v60, %v2212_v15  ;;  %v726_v20 = vsel %vm281_vm4, %v568_v55, %v2211_v16 }
 0x7cc   :  { %v728_v22 = vpack.c.bf16 %v727_v18, %v726_v20 }
 0x7ce   :  { %2067 = vmatmul.mubr.msk.bf16.vlgmr.msra.gmra.mrb[28].mxu1 %vm139_vm2, %v728_v22 }
 0x7cf   :  { %2082 = vmatprep.mubr.msk.bf16.mxu1 %vm2329_vm3, %v2328_v51  ;;  %2079 = vmatpush3.bf16.xpose.msra.mxu1 %v920_v0 }
 0x7d0   :  { %2080 = vmatprep.subr.bf16.mxu1 %v2328_v51 }
 0x7d7   :  { %2081 = vmatpush3.bf16.xpose.msra.mxu1 %v923_v2 }
 0x7d8   :  { %2100 = vmatprep.subr.bf16.mxu1 %v2328_v51 }
 0x8a1   :  { %v778_v24 = vpop.f32.mrb[28].mxu1 }
 0x8a2   :  { %v779_v25 = vadd.f32 %v778_v24, %v732_v23  ;;  %v2068_v26 = vpop.f32.mrb[29].mxu1 }
 0x8a3   :  { %v781_v27 = vpop.f32.mrb[30].mxu1 }
 0x8a4   :  { %v782_v28 = vadd.f32 %v781_v27, %v732_v23  ;;  %v2069_v29 = vpop.f32.mrb[31].mxu1  ;;  %v785_v30 = vadd.f32 %v779_v25, %v2460_v3 }
 0x8a6   :  { %v787_v31 = vsel %vm139_vm2, %v785_v30, 0.0  ;;  %v786_v32 = vadd.f32 %v782_v28, %v2462_v4  ;;  %v2224_v4 = vld [vmem:[%s2834_s5 + $0x8] ss:$16 sps:$4 sm:$0xff]  }
 0x8a7   :  { %788 = vadd.xlane.f32.xlu1 %v787_v31  ;;  %2071 = vmatpush3.bf16.msra.mxu0 %v2224_v4 }
 0x8a8   :  { %v790_v33 = vsel %vm139_vm2, %v786_v32, 0.0  ;;  %2072 = vmatprep.subr.bf16.mxu0 %v2328_v51 }
 0x8a9   :  { %791 = vadd.xlane.f32.xlu0 %v790_v33 }
 0x8ab   :  { %2073 = vmatpush3.bf16.msra.mxu0 %v2226_v41 }
 0x8ac   :  { %2086 = vmatprep.subr.bf16.mxu0 %v2328_v51 }
 0x934   :  { %v789_v34 = vpop.xlane.xlu1 %788 }
 0x935   :  { %v793_v35 = vmul.f32 0.03125, %v789_v34 }
 0x936   :  { %v792_v37 = vpop.xlane.xlu0 %791 }
 0x937   :  { %v795_v19 = vsub.f32 %v785_v30, %v793_v35  ;;  %v794_v21 = vmul.f32 0.03125, %v792_v37 }
 0x939   :  { %v796_v17 = vsub.f32 %v786_v32, %v794_v21  ;;  %v797_v38 = vmul.f32 %v795_v19, %v795_v19 }
 0x93b   :  { %v799_v39 = vsel %vm139_vm2, %v797_v38, 0.0  ;;  %v798_v40 = vmul.f32 %v796_v17, %v796_v17 }
 0x93c   :  { %800 = vadd.xlane.f32.xlu0 %v799_v39 }
 0x93d   :  { %v802_v3 = vsel %vm139_vm2, %v798_v40, 0.0 }
 0x93e   :  { %803 = vadd.xlane.f32.xlu1 %v802_v3 }
 0x9c9   :  { %v801_v42 = vpop.xlane.xlu0 %800 }
 0x9ca   :  { %v805_v43 = vmul.f32 0.03125, %v801_v42 }
 0x9cb   :  { %v804_v44 = vpop.xlane.xlu1 %803 }
 0x9cc   :  { %v807_v46 = vadd.f32 1e-12, %v805_v43  ;;  %v806_v47 = vmul.f32 0.03125, %v804_v44 }
 0x9ce   :  { %2262 = vrsqrt.f32 %v807_v46  ;;  %v808_v48 = vadd.f32 1e-12, %v806_v47 }
 0x9d0   :  { %2264 = vrsqrt.f32 %v808_v48 }
 0x9d8   :  { %v2263_v53 = vpop.eup %2262 }
 0x9d9   :  { %v811_v54 = vmul.f32 %v2263_v53, %v795_v19 }
 0x9da   :  { %v2265_v55 = vpop.eup %2264 }
 0x9db   :  { %v817_v56 = vmul.f32 %v816_v50, %v811_v54  ;;  %v812_v57 = vmul.f32 %v2265_v55, %v796_v17  ;;  %v907_v17 = vsub.s32 3, %v2470_v6 }
 0x9dd   :  { %v818_v59 = vmul.f32 %v816_v50, %v812_v57  ;;  %v823_v60 = vadd.f32 %v822_v58, %v817_v56  ;;  %v908_v38 = vrot.slane %v2478_v8, %v907_v17 }
 0x9df   :  { %v824_v61 = vadd.f32 %v822_v58, %v818_v59 }
 0x9e1   :  { %v825_v62 = vpack.c.bf16 %v824_v61, %v823_v60 }
 0x9e3   :  { %2075 = vmatmul.mubr.msk.bf16.vlgmr.msra.gmra.mrb[12].mxu0 %vm139_vm2, %v825_v62  ;;  %v2232_v62 = vld [vmem:[%s2834_s5 + $0x60] ss:$16 sps:$4 sm:$0xff]  }
 0x9e4   :  { %2090 = vmatprep.mubr.msk.bf16.mxu0 %vm2329_vm3, %v2328_v51 }
 0xab6   :  { %v879_v10 = vpop.f32.mrb[12].mxu0 }
 0xab7   :  { %v880_v11 = vadd.f32 %v879_v10, %v829_v9  ;;  %v2076_v12 = vpop.f32.mrb[13].mxu0 }
 0xab8   :  { %v882_v13 = vpop.f32.mrb[14].mxu0 }
 0xab9   :  { %v886_v15 = vmul.f32 %v880_v11, %v880_v11  ;;  %v883_v16 = vadd.f32 %v882_v13, %v829_v9  ;;  %v2077_v18 = vpop.f32.mrb[15].mxu0  ;;  %v1002_v13 = vsub.s32 7, %v2470_v6 }
 0xabb   :  { %v888_v20 = vmul.f32 %v886_v15, %v880_v11  ;;  %v887_v22 = vmul.f32 %v883_v16, %v883_v16 }
 0xabd   :  { %v890_v23 = vmul.f32 0.044715, %v888_v20  ;;  %v889_v24 = vmul.f32 %v887_v22, %v883_v16 }
 0xabf   :  { %v892_v25 = vadd.f32 %v890_v23, %v880_v11  ;;  %v891_v26 = vmul.f32 0.044715, %v889_v24  ;;  %v1003_v23 = vrot.slane %v2478_v8, %v1002_v13 }
 0xac1   :  { %v894_v27 = vmul.f32 0.7978846, %v892_v25  ;;  %v893_v28 = vadd.f32 %v891_v26, %v883_v16 }
 0xac3   :  { %2266 = vtanh.f32 %v894_v27  ;;  %v895_v29 = vmul.f32 0.7978846, %v893_v28  ;;  %v2672_v28 = vld [vmem:[%s2835_s6 + $0x8] sm:$0xff] }
 0xac5   :  { %2268 = vtanh.f32 %v895_v29 }
 0xacd   :  { %v2267_v30 = vpop.eup %2266 }
 0xace   :  { %v898_v31 = vadd.f32 1.0, %v2267_v30 }
 0xacf   :  { %v2269_v32 = vpop.eup %2268 }
 0xad0   :  { %v900_v33 = vmul.f32 0.5, %v898_v31  ;;  %v899_v34 = vadd.f32 1.0, %v2269_v32 }
 0xad2   :  { %v901_v35 = vmul.f32 0.5, %v899_v34  ;;  %v902_v37 = vmul.f32 %v900_v33, %v880_v11  ;;  %v996_v11 = vsub.s32 6, %v2470_v6 }
 0xad4   :  { %v903_v19 = vmul.f32 %v901_v35, %v883_v16  ;;  %v997_v12 = vrot.slane %v2478_v8, %v996_v11  ;;  %v1021_v8 = vrot.slane %v2672_v28, %v2473_v7 }
 0xad6   :  { %v904_v21 = vpack.c.bf16 %v903_v19, %v902_v37 }
 0xad8   :  { %2083 = vmatmul.mubr.msk.bf16.vlgmr.msra.gmra.mrb[32].mxu1 %vm915_vm7, %v904_v21 }
 0xad9   :  { %2102 = vmatprep.mubr.msk.bf16.mxu1 %vm2329_vm3, %v2328_v51 }
 0xbab   :  { %v959_v39 = vpop.f32.mrb[32].mxu1 }
 0xbac   :  { %v960_v40 = vadd.f32 %v959_v39, %v908_v38  ;;  %v2084_v3 = vpop.f32.mrb[33].mxu1 }
 0xbad   :  { %v962_v4 = vpop.f32.mrb[34].mxu1 }
 0xbae   :  { %v963_v41 = vadd.f32 %v962_v4, %v908_v38  ;;  %v2085_v42 = vpop.f32.mrb[35].mxu1  ;;  %v966_v43 = vadd.f32 %v960_v40, %v823_v60 }
 0xbb0   :  { %v968_v44 = vsel %vm139_vm2, %v966_v43, 0.0  ;;  %v967_v46 = vadd.f32 %v963_v41, %v824_v61  ;;  %v2230_v61 = vld [vmem:[%s2834_s5 + $0x40] ss:$16 sps:$4 sm:$0xff]  }
 0xbb1   :  { %969 = vadd.xlane.f32.xlu0 %v968_v44  ;;  %2087 = vmatpush3.bf16.msra.mxu0 %v2230_v61 }
 0xbb2   :  { %v971_v47 = vsel %vm139_vm2, %v967_v46, 0.0  ;;  %2088 = vmatprep.subr.bf16.mxu0 %v2328_v51 }
 0xbb3   :  { %972 = vadd.xlane.f32.xlu1 %v971_v47 }
 0xbb5   :  { %2089 = vmatpush3.bf16.msra.mxu0 %v2232_v62 }
 0xbb6   :  { %2094 = vmatprep.subr.bf16.mxu0 %v2328_v51 }
 0xc3e   :  { %v970_v48 = vpop.xlane.xlu0 %969 }
 0xc3f   :  { %v974_v50 = vmul.f32 0.03125, %v970_v48 }
 0xc40   :  { %v973_v53 = vpop.xlane.xlu1 %972 }
 0xc41   :  { %v976_v54 = vsub.f32 %v966_v43, %v974_v50  ;;  %v975_v55 = vmul.f32 0.03125, %v973_v53 }
 0xc43   :  { %v977_v56 = vsub.f32 %v967_v46, %v975_v55  ;;  %v978_v57 = vmul.f32 %v976_v54, %v976_v54 }
 0xc45   :  { %v980_v58 = vsel %vm139_vm2, %v978_v57, 0.0  ;;  %v979_v59 = vmul.f32 %v977_v56, %v977_v56 }
 0xc46   :  { %981 = vadd.xlane.f32.xlu0 %v980_v58 }
 0xc47   :  { %v983_v60 = vsel %vm139_vm2, %v979_v59, 0.0 }
 0xc48   :  { %984 = vadd.xlane.f32.xlu1 %v983_v60 }
 0xcd3   :  { %v982_v63 = vpop.xlane.xlu0 %981 }
 0xcd4   :  { %v986_v0 = vmul.f32 0.03125, %v982_v63 }
 0xcd5   :  { %v985_v1 = vpop.xlane.xlu1 %984 }
 0xcd6   :  { %v988_v2 = vadd.f32 1e-12, %v986_v0  ;;  %v987_v9 = vmul.f32 0.03125, %v985_v1 }
 0xcd8   :  { %2270 = vrsqrt.f32 %v988_v2  ;;  %v989_v10 = vadd.f32 1e-12, %v987_v9 }
 0xcda   :  { %2272 = vrsqrt.f32 %v989_v10 }
 0xce2   :  { %v2271_v15 = vpop.eup %2270 }
 0xce3   :  { %v992_v16 = vmul.f32 %v2271_v15, %v976_v54 }
 0xce4   :  { %v2273_v18 = vpop.eup %2272 }
 0xce5   :  { %v998_v20 = vmul.f32 %v997_v12, %v992_v16  ;;  %v993_v22 = vmul.f32 %v2273_v18, %v977_v56 }
 0xce7   :  { %v999_v24 = vmul.f32 %v997_v12, %v993_v22  ;;  %v2660_v25 = vadd.f32 %v1003_v23, %v998_v20 }
 0xce9   :  { %v2662_v26 = vadd.f32 %v1003_v23, %v999_v24 }
 0xceb   :  { %v1017_v27 = vpack.c.bf16 %v2662_v26, %v2660_v25 }
 0xced   :  { %2091 = vmatmul.mubr.msk.bf16.vlgmr.msra.gmra.mrb[16].mxu0 %vm139_vm2, %v1017_v27 }
 0xcee   :  { %2096 = vmatprep.mubr.msk.bf16.mxu0 %vm2329_vm3, %v2328_v51 }
 0xdc0   :  { %v1071_v29 = vpop.f32.mrb[16].mxu0 }
 0xdc1   :  { %v1072_v30 = vadd.f32 %v1071_v29, %v1021_v8  ;;  %v2092_v31 = vpop.f32.mrb[17].mxu0 }
 0xdc2   :  { %v1074_v32 = vpop.f32.mrb[18].mxu0 }
 0xdc3   :  { %v2676_v33 = vpack.c.bf16 %v1072_v30, %v1072_v30  ;;  %v1075_v34 = vadd.f32 %v1074_v32, %v1021_v8  ;;  %v2093_v35 = vpop.f32.mrb[19].mxu0 }
 0xdc5   :  { %v1896_v37 = vpack.c.bf16 %v1075_v34, %v1075_v34  ;;  %1084 = vrot.lane.b32.xlu0 %v2676_v33, %s2330_s23 }
 0xdc7   :  { %1086 = vrot.lane.b32.xlu1 %v1896_v37, %s2330_s23 }
 0xdc9   :  { %1136 = vrot.lane.b32.xlu0 %v1896_v37, %s2331_s24 }
 0xdcb   :  { %1088 = vrot.lane.b32.xlu1 %v2676_v33, %s2331_s24 }
 0xe37   :  { %v1085_v7 = vpop.permute.xlu0 %1084 }
 0xe38   :  { %v2684_v19 = vcombine.low %v1085_v7, %v1085_v7 }
 0xe39   :  { %v1087_v21 = vpop.permute.xlu1 %1086 }
 0xe3a   :  { %v2686_v38 = vcombine.low %v1087_v21, %v1087_v21  ;;  %1186 = vrot.lane.b32.xlu1 %v2684_v19, %s2331_s24 }
 0xe3b   :  { %v1137_v39 = vpop.permute.xlu0 %1136 }
 0xe3c   :  { %v1142_v40 = vsel %vm281_vm4, %v1137_v39, 0  ;;  %1236 = vrot.lane.b32.xlu0 %v2686_v38, %s2331_s24 }
 0xe3d   :  { %2101 = vmatpush3.bf16.xpose.msra.mxu1 %v1142_v40  ;;  %v1089_v3 = vpop.permute.xlu1 %1088 }
 0xe3e   :  { %v1094_v4 = vsel %vm281_vm4, %v1089_v3, 0  ;;  %2112 = vmatprep.subr.bf16.mxu1 %v2328_v51 }
 0xe3f   :  { %2095 = vmatpush3.bf16.xpose.msra.mxu0 %v1094_v4 }
 0xe40   :  { %2106 = vmatprep.subr.bf16.mxu0 %v2328_v51 }
 0xe44   :  { %2103 = vmatmul.mubr.msk.bf16.vlgmr.msra.gmra.mrb[36].mxu1 %vm281_vm4, %v1896_v37 }
 0xe45   :  { %2114 = vmatprep.mubr.msk.bf16.mxu1 %vm2329_vm3, %v2328_v51 }
 0xe46   :  { %2097 = vmatmul.mubr.msk.bf16.vlgmr.msra.gmra.mrb[20].mxu0 %vm281_vm4, %v2676_v33 }
 0xe47   :  { %2108 = vmatprep.mubr.msk.bf16.mxu0 %vm2329_vm3, %v2328_v51 }
 0xeac   :  { %v1187_v41 = vpop.permute.xlu1 %1186 }
 0xead   :  { %v1192_v42 = vsel %vm281_vm4, %v1187_v41, 0 }
 0xeae   :  { %v1237_v43 = vpop.permute.xlu0 %1236  ;;  %2107 = vmatpush3.bf16.xpose.msra.mxu0 %v1192_v42 }
 0xeaf   :  { %v1242_v44 = vsel %vm281_vm4, %v1237_v43, 0  ;;  %2118 = vmatprep.subr.bf16.mxu0 %v2328_v51 }
 0xeb0   :  { %2113 = vmatpush3.bf16.xpose.msra.mxu1 %v1242_v44 }
 0xeb1   :  { %2124 = vmatprep.subr.bf16.mxu1 %v2328_v51 }
 0xeb5   :  { %2109 = vmatmul.mubr.msk.bf16.vlgmr.msra.gmra.mrb[24].mxu0 %vm281_vm4, %v1085_v7 }
 0xeb6   :  { %2120 = vmatprep.mubr.msk.bf16.mxu0 %vm2329_vm3, %v2328_v51 }
 0xeb7   :  { %2115 = vmatmul.mubr.msk.bf16.vlgmr.msra.gmra.mrb[40].mxu1 %vm281_vm4, %v1087_v21 }
 0xeb8   :  { %2126 = vmatprep.mubr.msk.bf16.mxu1 %vm2329_vm3, %v2328_v51 }
 0xf17   :  { %v1178_v46 = vpop.f32.mrb[36].mxu1 }
 0xf18   :  { %v1179_v47 = vadd.f32 %v1178_v46, %v2536_v45  ;;  %v2104_v48 = vpop.f32.mrb[37].mxu1 }
 0xf19   :  { %v1130_v50 = vpop.f32.mrb[20].mxu0  ;;  %v1181_v53 = vpop.f32.mrb[38].mxu1 }
 0xf1a   :  { %v1131_v54 = vadd.f32 %v1130_v50, %v2531_v36  ;;  %v2098_v55 = vpop.f32.mrb[21].mxu0  ;;  %v2105_v56 = vpop.f32.mrb[39].mxu1  ;;  %v1287_v57 = vsel %vm476_vm5, %v1179_v47, -inf }
 0xf1b   :  { %v1133_v58 = vpop.f32.mrb[22].mxu0  ;;  %1288 = vmax.xlane.f32.xlu0 %v1287_v57 }
 0xf1c   :  { %v2099_v59 = vpop.f32.mrb[23].mxu0  ;;  %v1284_v60 = vsel %vm476_vm5, %v1131_v54, -inf }
 0xf1d   :  { %1285 = vmax.xlane.f32.xlu1 %v1284_v60 }
 0xf88   :  { %v1228_v61 = vpop.f32.mrb[24].mxu0 }
 0xf89   :  { %v1229_v62 = vadd.f32 %v1228_v61, %v2531_v36  ;;  %v2110_v63 = vpop.f32.mrb[25].mxu0 }
 0xf8a   :  { %v1231_v0 = vpop.f32.mrb[26].mxu0  ;;  %v1278_v1 = vpop.f32.mrb[40].mxu1 }
 0xf8b   :  { %v1279_v2 = vadd.f32 %v1278_v1, %v2536_v45  ;;  %v2111_v9 = vpop.f32.mrb[27].mxu0  ;;  %v2116_v10 = vpop.f32.mrb[41].mxu1  ;;  %v1290_v12 = vsel %vm476_vm5, %v1229_v62, -inf  ;;  %v2234_v1 = vld [vmem:[%s2834_s5 + $0x44] ss:$16 sps:$4 sm:$0xff]  }
 0xf8c   :  { %1291 = vmax.xlane.f32.xlu0 %v1290_v12  ;;  %v1281_v15 = vpop.f32.mrb[42].mxu1 }
 0xf8d   :  { %v2117_v16 = vpop.f32.mrb[43].mxu1  ;;  %v1293_v18 = vsel %vm476_vm5, %v1279_v2, -inf }
 0xf8e   :  { %1294 = vmax.xlane.f32.xlu1 %v1293_v18 }
 0xf9f   :  { %1380 = vrot.lane.b32.xlu1 %v1896_v37, %s2332_s1 }
 0xfa2   :  { %1332 = vrot.lane.b32.xlu0 %v2676_v33, %s2332_s1 }
 0xfa8   :  { %v1289_v36 = vpop.xlane.xlu0 %1288 }
 0xfa9   :  { %v1297_v23 = vsub.f32 %v1179_v47, %v1289_v36 }
 0xfaa   :  { %v1286_v20 = vpop.xlane.xlu1 %1285 }
 0xfab   :  { %v1296_v22 = vsub.f32 %v1131_v54, %v1286_v20  ;;  %v1302_v24 = vmul.f32 1.442695, %v1297_v23  ;;  %v2235_v20 = vld [vmem:[%s2834_s5 + $0x64] ss:$16 sps:$4 sm:$0xff]  }
 0xfad   :  { %v1300_v45 = vmul.f32 1.442695, %v1296_v22 }
 0xfaf   :  { %2274 = vpow2.f32 %v1300_v45 }
 0xfb0   :  { %2276 = vpow2.f32 %v1302_v24 }
 0xfb9   :  { %v2275_v27 = vpop.eup %2274 }
 0xfba   :  { %v2277_v8 = vpop.eup %2276  ;;  %v1308_v29 = vsel %vm476_vm5, %v2275_v27, 0.0 }
 0xfbb   :  { %v1311_v30 = vsel %vm476_vm5, %v2277_v8, 0.0 }
 0xfc1   :  { %1309 = vadd.xlane.f32.xlu0 %v1308_v29 }
 0xfc3   :  { %1312 = vadd.xlane.f32.xlu1 %v1311_v30 }
0x1019   :  { %v1292_v31 = vpop.xlane.xlu0 %1291 }
0x101a   :  { %v1298_v32 = vsub.f32 %v1229_v62, %v1292_v31 }
0x101b   :  { %v1295_v34 = vpop.xlane.xlu1 %1294 }
0x101c   :  { %v1304_v33 = vmul.f32 1.442695, %v1298_v32  ;;  %v1299_v35 = vsub.f32 %v1279_v2, %v1295_v34 }
0x101d   :  { %v1333_v37 = vpop.permute.xlu0 %1332 }
0x101e   :  { %2278 = vpow2.f32 %v1304_v33  ;;  %v1306_v7 = vmul.f32 1.442695, %v1299_v35  ;;  %v1338_v21 = vsel %vm530_vm6, %v1333_v37, 0 }
0x101f   :  { %2119 = vmatpush3.bf16.msra.mxu0 %v1338_v21  ;;  %v1381_v39 = vpop.permute.xlu1 %1380  ;;  %v1538_v21 = vrot.slane %v2672_v28, %v731_v14 }
0x1020   :  { %2280 = vpow2.f32 %v1306_v7  ;;  %v1386_v40 = vsel %vm530_vm6, %v1381_v39, 0  ;;  %2130 = vmatprep.subr.bf16.mxu0 %v2328_v51 }
0x1021   :  { %2125 = vmatpush3.bf16.msra.mxu1 %v1386_v40 }
0x1022   :  { %2136 = vmatprep.subr.bf16.mxu1 %v2328_v51 }
0x1028   :  { %v2279_v3 = vpop.eup %2278 }
0x1029   :  { %v1314_v4 = vsel %vm476_vm5, %v2279_v3, 0.0 }
0x102a   :  { %v2281_v41 = vpop.eup %2280  ;;  %1315 = vadd.xlane.f32.xlu0 %v1314_v4 }
0x102b   :  { %v1317_v42 = vsel %vm476_vm5, %v2281_v41, 0.0 }
0x102c   :  { %1318 = vadd.xlane.f32.xlu1 %v1317_v42 }
0x103d   :  { %1428 = vrot.lane.b32.xlu1 %v2684_v19, %s2332_s1 }
0x1040   :  { %1476 = vrot.lane.b32.xlu0 %v2686_v38, %s2332_s1 }
0x104e   :  { %v1310_v43 = vpop.xlane.xlu0 %1309 }
0x104f   :  { %2282 = vrcp.f32 %v1310_v43 }
0x1050   :  { %v1313_v44 = vpop.xlane.xlu1 %1312 }
0x1051   :  { %2284 = vrcp.f32 %v1313_v44 }
0x1059   :  { %v2283_v46 = vpop.eup %2282 }
0x105a   :  { %v1324_v47 = vmul.f32 %v2283_v46, %v2275_v27 }
0x105b   :  { %v2285_v48 = vpop.eup %2284 }
0x105c   :  { %v1325_v50 = vmul.f32 %v2285_v48, %v2277_v8  ;;  %v1328_v53 = vpack.c.bf16 %v1324_v47, %v1324_v47 }
0x105e   :  { %2121 = vmatmul.mubr.msk.bf16.vlgmr.msra.gmra.mrb[28].mxu0 %vm476_vm5, %v1328_v53  ;;  %v1329_v54 = vpack.c.bf16 %v1325_v50, %v1325_v50 }
0x105f   :  { %2132 = vmatprep.mubr.msk.bf16.mxu0 %vm2329_vm3, %v2328_v51 }
0x1060   :  { %2127 = vmatmul.mubr.msk.bf16.vlgmr.msra.gmra.mrb[44].mxu1 %vm476_vm5, %v1329_v54 }
0x1061   :  { %2138 = vmatprep.mubr.msk.bf16.mxu1 %vm2329_vm3, %v2328_v51 }
0x10b7   :  { %v1316_v19 = vpop.xlane.xlu0 %1315 }
0x10b8   :  { %2286 = vrcp.f32 %v1316_v19 }
0x10b9   :  { %v1319_v38 = vpop.xlane.xlu1 %1318 }
0x10ba   :  { %2288 = vrcp.f32 %v1319_v38 }
0x10bb   :  { %v1477_v55 = vpop.permute.xlu0 %1476 }
0x10bc   :  { %v1482_v56 = vsel %vm530_vm6, %v1477_v55, 0 }
0x10bd   :  { %2137 = vmatpush3.bf16.msra.mxu1 %v1482_v56  ;;  %v1429_v57 = vpop.permute.xlu1 %1428 }
0x10be   :  { %v1434_v58 = vsel %vm530_vm6, %v1429_v57, 0  ;;  %2150 = vmatprep.subr.bf16.mxu1 %v2328_v51  ;;  %v2238_v57 = vld [vmem:[%s2834_s5 + $0x68] ss:$16 sps:$4 sm:$0xff]  }
0x10bf   :  { %2131 = vmatpush3.bf16.msra.mxu0 %v1434_v58 }
0x10c0   :  { %2142 = vmatprep.subr.bf16.mxu0 %v2328_v51 }
0x10c2   :  { %v2287_v59 = vpop.eup %2286 }
0x10c3   :  { %v1326_v60 = vmul.f32 %v2287_v59, %v2279_v3 }
0x10c4   :  { %v2289_v61 = vpop.eup %2288 }
0x10c5   :  { %v1327_v62 = vmul.f32 %v2289_v61, %v2281_v41  ;;  %v1330_v63 = vpack.c.bf16 %v1326_v60, %v1326_v60 }
0x10c7   :  { %2133 = vmatmul.mubr.msk.bf16.vlgmr.msra.gmra.mrb[32].mxu0 %vm476_vm5, %v1330_v63  ;;  %v1331_v0 = vpack.c.bf16 %v1327_v62, %v1327_v62 }
0x10c8   :  { %2146 = vmatprep.mubr.msk.bf16.mxu0 %vm2329_vm3, %v2328_v51  ;;  %2143 = vmatpush3.bf16.msra.mxu0 %v2234_v1  ;;  %v1622_v1 = vrot.slane %v2672_v28, %v815_v49 }
0x10c9   :  { %2139 = vmatmul.mubr.msk.bf16.vlgmr.msra.gmra.mrb[48].mxu1 %vm476_vm5, %v1331_v0  ;;  %2144 = vmatprep.subr.bf16.mxu0 %v2328_v51 }
0x10ca   :  { %2154 = vmatprep.mubr.msk.bf16.mxu1 %vm2329_vm3, %v2328_v51 }
0x10cc   :  { %2145 = vmatpush3.bf16.msra.mxu0 %v2235_v20 }
0x10cd   :  { %2158 = vmatprep.subr.bf16.mxu0 %v2328_v51 }
0x1131   :  { %v1374_v2 = vpop.f32.mrb[28].mxu0 }
0x1132   :  { %v2122_v9 = vpop.f32.mrb[29].mxu0 }
0x1133   :  { %v1377_v10 = vpop.f32.mrb[30].mxu0  ;;  %v1422_v12 = vpop.f32.mrb[44].mxu1 }
0x1134   :  { %v2123_v15 = vpop.f32.mrb[31].mxu0  ;;  %v2128_v16 = vpop.f32.mrb[45].mxu1 }
0x1135   :  { %v1425_v18 = vpop.f32.mrb[46].mxu1  ;;  %v1628_v15 = vrot.slane %v2672_v28, %v821_v52 }
0x1136   :  { %v2129_v36 = vpop.f32.mrb[47].mxu1 }
0x119a   :  { %v1470_v22 = vpop.f32.mrb[32].mxu0 }
0x119b   :  { %v2134_v23 = vpop.f32.mrb[33].mxu0 }
0x119c   :  { %v1473_v45 = vpop.f32.mrb[34].mxu0  ;;  %v1518_v24 = vpop.f32.mrb[48].mxu1  ;;  %v2241_v23 = vld [vmem:[%s2834_s5 + $0x6c] ss:$16 sps:$4 sm:$0xff]  }
0x119d   :  { %v2213_v27 = vpack.i.bf16 %v1518_v24, %v1470_v22  ;;  %v2135_v8 = vpop.f32.mrb[35].mxu0  ;;  %v2140_v29 = vpop.f32.mrb[49].mxu1  ;;  %v2240_v22 = vld [vmem:[%s2834_s5 + $0x4c] ss:$16 sps:$4 sm:$0xff]   ;;  %v1728_v52 = vsel %vm915_vm7, %v2241_v23, 0  ;;  %v1635_v45 = vrot.slane %v2672_v28, %v828_v5 }
0x119e   :  { %v1521_v30 = vpop.f32.mrb[50].mxu1  ;;  %v1725_v49 = vsel %vm915_vm7, %v2240_v22, 0 }
0x119f   :  { %2214 = vrot.lane.b32.xlu1 %v2213_v27, %s2333_s10  ;;  %v2141_v31 = vpop.f32.mrb[51].mxu1 }
0x1211   :  { %v2215_v32 = vpop.permute.xlu1 %2214 }
0x1212   :  { %v2217_v34 = vunpack.i.h.bf16 %v2215_v32  ;;  %v2216_v33 = vunpack.i.l.bf16 %v2215_v32 }
0x1214   :  { %v1533_v35 = vsel %vm281_vm4, %v1422_v12, %v2217_v34  ;;  %v1532_v37 = vsel %vm281_vm4, %v1374_v2, %v2216_v33 }
0x1215   :  { %v1534_v7 = vpack.c.bf16 %v1533_v35, %v1532_v37 }
0x1217   :  { %2147 = vmatmul.mubr.msk.bf16.vlgmr.msra.gmra.mrb[36].mxu0 %vm139_vm2, %v1534_v7 }
0x1218   :  { %2162 = vmatprep.mubr.msk.bf16.mxu0 %vm2329_vm3, %v2328_v51  ;;  %2159 = vmatpush3.bf16.xpose.msra.mxu0 %v1725_v49 }
0x1219   :  { %2160 = vmatprep.subr.bf16.mxu0 %v2328_v51 }
0x1220   :  { %2161 = vmatpush3.bf16.xpose.msra.mxu0 %v1728_v52 }
0x12ea   :  { %v1584_v39 = vpop.f32.mrb[36].mxu0 }
0x12eb   :  { %v1585_v40 = vadd.f32 %v1584_v39, %v1538_v21  ;;  %v2148_v3 = vpop.f32.mrb[37].mxu0 }
0x12ec   :  { %v1587_v4 = vpop.f32.mrb[38].mxu0 }
0x12ed   :  { %v1588_v41 = vadd.f32 %v1587_v4, %v1538_v21  ;;  %v2149_v42 = vpop.f32.mrb[39].mxu0  ;;  %v1591_v43 = vadd.f32 %v1585_v40, %v2660_v25 }
0x12ef   :  { %v1593_v44 = vsel %vm139_vm2, %v1591_v43, 0.0  ;;  %v1592_v46 = vadd.f32 %v1588_v41, %v2662_v26  ;;  %v2236_v26 = vld [vmem:[%s2834_s5 + $0x48] ss:$16 sps:$4 sm:$0xff]   ;;  %s2334_s5 = smov [#allocation3]  }
0x12f0   :  { %1594 = vadd.xlane.f32.xlu0 %v1593_v44  ;;  %2151 = vmatpush3.bf16.msra.mxu1 %v2236_v26  ;;  %s1822_s8 = sshll.u32 %s2334_s5, 4  ;;  %s1823_s8 = int_to_ptr.vmem [resolvable:$true] %s1822_s8 }
0x12f1   :  { %v1596_v47 = vsel %vm139_vm2, %v1592_v46, 0.0  ;;  %2152 = vmatprep.subr.bf16.mxu1 %v2328_v51  ;;  %s2302_s9 = scalar_lea.vmem %s1823_s8, 32  ;;  %p2307_p1 = scmp.lt.s32.totalorder %s1823_s8, %s1823_s8 }
0x12f2   :  { %1597 = vadd.xlane.f32.xlu1 %v1596_v47  ;;  %p2303_p0 = scmp.ne.s32.totalorder %s1823_s8, %s2302_s9  ;;  %p2308_p2 = scmp.lt.s32.totalorder %s2302_s9, %s2302_s9 }
0x12f4   :  { %2153 = vmatpush3.bf16.msra.mxu1 %v2238_v57  ;;  %p2309_p3 = por %p2308_p2, %p2307_p1 }
0x12f6   :  { %p2310_p4 = pnand %p2309_p3, %p2303_p0 }
0x137d   :  { %v1595_v48 = vpop.xlane.xlu0 %1594 }
0x137e   :  { %v1599_v50 = vmul.f32 0.03125, %v1595_v48  ;;  %v1714_v48 = vrot.slane %v2672_v28, %v907_v17 }
0x137f   :  { %v1598_v53 = vpop.xlane.xlu1 %1597 }
0x1380   :  { %v1601_v14 = vsub.f32 %v1591_v43, %v1599_v50  ;;  %v1600_v54 = vmul.f32 0.03125, %v1598_v53 }
0x1382   :  { %v1602_v19 = vsub.f32 %v1592_v46, %v1600_v54  ;;  %v1603_v38 = vmul.f32 %v1601_v14, %v1601_v14 }
0x1384   :  { %v1605_v55 = vsel %vm139_vm2, %v1603_v38, 0.0  ;;  %v1604_v56 = vmul.f32 %v1602_v19, %v1602_v19 }
0x1385   :  { %1606 = vadd.xlane.f32.xlu0 %v1605_v55 }
0x1386   :  { %v1608_v25 = vsel %vm139_vm2, %v1604_v56, 0.0 }
0x1389   :  { %1609 = vadd.xlane.f32.xlu0 %v1608_v25 }
0x1412   :  { %v1607_v58 = vpop.xlane.xlu0 %1606 }
0x1413   :  { %v1611_v59 = vmul.f32 0.03125, %v1607_v58 }
0x1415   :  { %v1613_v60 = vadd.f32 1e-12, %v1611_v59 }
0x1416   :  { %v1610_v61 = vpop.xlane.xlu0 %1609 }
0x1417   :  { %2290 = vrsqrt.f32 %v1613_v60  ;;  %v1612_v62 = vmul.f32 0.03125, %v1610_v61 }
0x1419   :  { %v1614_v63 = vadd.f32 1e-12, %v1612_v62 }
0x141b   :  { %2292 = vrsqrt.f32 %v1614_v63 }
0x1421   :  { %v2291_v0 = vpop.eup %2290 }
0x1422   :  { %v1617_v2 = vmul.f32 %v2291_v0, %v1601_v14 }
0x1424   :  { %v1623_v10 = vmul.f32 %v1622_v1, %v1617_v2 }
0x1425   :  { %v2293_v9 = vpop.eup %2292 }
0x1426   :  { %v1618_v12 = vmul.f32 %v2293_v9, %v1602_v19  ;;  %v1629_v18 = vadd.f32 %v1628_v15, %v1623_v10 }
0x1428   :  { %v1624_v16 = vmul.f32 %v1622_v1, %v1618_v12 }
0x142a   :  { %v1630_v36 = vadd.f32 %v1628_v15, %v1624_v16 }
0x142c   :  { %v1631_v20 = vpack.c.bf16 %v1630_v36, %v1629_v18 }
0x142e   :  { %2155 = vmatmul.mubr.msk.bf16.vlgmr.msra.gmra.mrb[52].mxu1 %vm139_vm2, %v1631_v20  ;;  %v1808_v20 = vrot.slane %v2672_v28, %v1002_v13 }
0x1501   :  { %v1685_v24 = vpop.f32.mrb[52].mxu1 }
0x1502   :  { %v1686_v27 = vadd.f32 %v1685_v24, %v1635_v45  ;;  %v2156_v8 = vpop.f32.mrb[53].mxu1 }
0x1503   :  { %v1688_v29 = vpop.f32.mrb[54].mxu1 }
0x1504   :  { %v1692_v30 = vmul.f32 %v1686_v27, %v1686_v27  ;;  %v1689_v31 = vadd.f32 %v1688_v29, %v1635_v45  ;;  %v2157_v32 = vpop.f32.mrb[55].mxu1 }
0x1506   :  { %v1694_v34 = vmul.f32 %v1692_v30, %v1686_v27  ;;  %v1693_v51 = vmul.f32 %v1689_v31, %v1689_v31 }
0x1508   :  { %v1696_v33 = vmul.f32 0.044715, %v1694_v34  ;;  %v1695_v35 = vmul.f32 %v1693_v51, %v1689_v31 }
0x150a   :  { %v1698_v37 = vadd.f32 %v1696_v33, %v1686_v27  ;;  %v1697_v7 = vmul.f32 0.044715, %v1695_v35 }
0x150c   :  { %v1700_v21 = vmul.f32 0.7978846, %v1698_v37  ;;  %v1699_v39 = vadd.f32 %v1697_v7, %v1689_v31 }
0x150e   :  { %2294 = vtanh.f32 %v1700_v21  ;;  %v1701_v40 = vmul.f32 0.7978846, %v1699_v39 }
0x1510   :  { %2296 = vtanh.f32 %v1701_v40 }
0x1518   :  { %v2295_v3 = vpop.eup %2294 }
0x1519   :  { %v1704_v5 = vadd.f32 1.0, %v2295_v3 }
0x151a   :  { %v2297_v4 = vpop.eup %2296 }
0x151b   :  { %v1706_v41 = vmul.f32 0.5, %v1704_v5  ;;  %v1705_v42 = vadd.f32 1.0, %v2297_v4 }
0x151d   :  { %v1707_v43 = vmul.f32 0.5, %v1705_v42  ;;  %v1708_v44 = vmul.f32 %v1706_v41, %v1686_v27 }
0x151f   :  { %v1709_v46 = vmul.f32 %v1707_v43, %v1689_v31 }
0x1521   :  { %v1710_v47 = vpack.c.bf16 %v1709_v46, %v1708_v44 }
0x1523   :  { %2163 = vmatmul.mubr.msk.bf16.vlgmr.msra.gmra.mrb[40].mxu0 %vm915_vm7, %v1710_v47 }
0x15f6   :  { %v1764_v50 = vpop.f32.mrb[40].mxu0 }
0x15f7   :  { %v1765_v53 = vadd.f32 %v1764_v50, %v1714_v48  ;;  %v2164_v14 = vpop.f32.mrb[41].mxu0 }
0x15f8   :  { %v1767_v54 = vpop.f32.mrb[42].mxu0 }
0x15f9   :  { %v1768_v19 = vadd.f32 %v1767_v54, %v1714_v48  ;;  %v2165_v38 = vpop.f32.mrb[43].mxu0  ;;  %v1771_v55 = vadd.f32 %v1765_v53, %v1629_v18  ;;  %v1802_v18 = vrot.slane %v2672_v28, %v996_v11 }
0x15fb   :  { %v1773_v56 = vsel %vm139_vm2, %v1771_v55, 0.0  ;;  %v1772_v25 = vadd.f32 %v1768_v19, %v1630_v36 }
0x15fc   :  { %1774 = vadd.xlane.f32.xlu1 %v1773_v56 }
0x15fd   :  { %v1776_v26 = vsel %vm139_vm2, %v1772_v25, 0.0 }
0x15fe   :  { %1777 = vadd.xlane.f32.xlu0 %v1776_v26 }
0x1689   :  { %v1775_v57 = vpop.xlane.xlu1 %1774 }
0x168a   :  { %v1779_v58 = vmul.f32 0.03125, %v1775_v57 }
0x168b   :  { %v1778_v59 = vpop.xlane.xlu0 %1777 }
0x168c   :  { %v1781_v60 = vsub.f32 %v1771_v55, %v1779_v58  ;;  %v1780_v61 = vmul.f32 0.03125, %v1778_v59 }
0x168e   :  { %v1782_v17 = vsub.f32 %v1772_v25, %v1780_v61  ;;  %v1783_v62 = vmul.f32 %v1781_v60, %v1781_v60 }
0x1690   :  { %v1785_v63 = vsel %vm139_vm2, %v1783_v62, 0.0  ;;  %v1784_v0 = vmul.f32 %v1782_v17, %v1782_v17 }
0x1691   :  { %1786 = vadd.xlane.f32.xlu1 %v1785_v63 }
0x1692   :  { %v1788_v1 = vsel %vm139_vm2, %v1784_v0, 0.0 }
0x1693   :  { %1789 = vadd.xlane.f32.xlu0 %v1788_v1 }
0x171e   :  { %v1787_v2 = vpop.xlane.xlu1 %1786 }
0x171f   :  { %v1791_v9 = vmul.f32 0.03125, %v1787_v2 }
0x1720   :  { %v1790_v10 = vpop.xlane.xlu0 %1789 }
0x1721   :  { %v1793_v12 = vadd.f32 1e-12, %v1791_v9  ;;  %v1792_v15 = vmul.f32 0.03125, %v1790_v10 }
0x1723   :  { %2298 = vrsqrt.f32 %v1793_v12  ;;  %v1794_v16 = vadd.f32 1e-12, %v1792_v15 }
0x1725   :  { %2300 = vrsqrt.f32 %v1794_v16 }
0x172d   :  { %v2299_v36 = vpop.eup %2298 }
0x172e   :  { %v1797_v22 = vmul.f32 %v2299_v36, %v1781_v60 }
0x172f   :  { %v2301_v49 = vpop.eup %2300 }
0x1730   :  { %v1803_v23 = vmul.f32 %v1802_v18, %v1797_v22  ;;  %v1798_v52 = vmul.f32 %v2301_v49, %v1782_v17 }
0x1732   :  { %v1809_v45 = vadd.f32 %v1808_v20, %v1803_v23  ;;  %v1804_v24 = vmul.f32 %v1802_v18, %v1798_v52 }
0x1734   :  { %1811 = vst.msk [vmem:[#allocation2] sm:$0xff] %vm139_vm2, %v1809_v45  ;;  %v1810_v27 = vadd.f32 %v1808_v20, %v1804_v24 }
0x1736   :  { %1812 = vst.msk [vmem:[#allocation2 + $0x8] sm:$0xff] %vm139_vm2, %v1810_v27 }
0x173d   :  { %v1813_v11 = vld [vmem:[#allocation2] ss:$8 sm:$0x3] }
0x173e   :  { %1815 = vst.msk [vmem:[#allocation3] sm:$0x3] %vm1814_vm8, %v1813_v11 }
0x173f   :  { %2313 = shalt.err (!%p2310_p4)
}
0x1740   :  { %s2314_s12 = scalar_lea.hbm %s2836_s7, 32 }
0x1741   :  { %p2315_p5 = scmp.ne.s32.totalorder %s2836_s7, %s2314_s12  ;;  %p2318_p6 = scmp.lt.u32.totalorder %s2314_s12, %s2836_s7 }
0x1743   :  { %p2320_p7 = pnand %p2318_p6, %p2315_p5 }
0x1745   :  { %2323 = shalt.err (!%p2320_p7)
}
0x1746   :  { %1825 = dma.vmem_to_hbm [thread:$0]  %s1823_s8, 32, %s2836_s7, [#allocation4]  }
0x1747   :  { %2324 = dma.done.wait [#allocation4], 32  }
0x1748   :  { %2325 = vsyncadd [#allocation4], 4294967264 }
0x1749   :  { %1829 = vsyncpa [#allocation4], 1 }

</bundles_post_ra>
